<compile_context>
chip_gen: v7x
topology: tpu7x:2x2x1
jax: 0.10.0
libtpu: 0.0.40
codegen_flags: <defaults>
</compile_context>

<pallas_src>
import math

import jax
import jax.numpy as jnp
from jax.experimental import pallas as pl
from jax.experimental.pallas import tpu as pltpu  # noqa: F401  (kept for TPU-specific tuning hooks)

# ---- Small synthetic config (consistent with the module's forward) ----------
B = 2            # batch
S = 8            # sequence length
H = 32           # bert hidden size
NUM_HEADS = 2
DH = H // NUM_HEADS
FF = 64          # intermediate (FFN) size
L = 2            # number of encoder layers
VOCAB = 30
HEAD_H = 16      # predictor hidden_size (scaled-down analogue of 256)
NUM_OUTPUTS = 1
BS = B * S
OUT_PAD = 128    # lane-dense padded output width for the head


def _layernorm(x, gamma, beta, eps=1e-12):
    mu = jnp.mean(x, axis=-1, keepdims=True)
    var = jnp.mean((x - mu) ** 2, axis=-1, keepdims=True)
    return (x - mu) * jax.lax.rsqrt(var + eps) * gamma + beta


def _gelu(x):
    # TODO(synk): HF BERT default is exact (erf) GELU; tanh approximation kept for
    # Mosaic-lowering safety (tiny numerical drift vs. the PyTorch reference).
    c = math.sqrt(2.0 / math.pi)
    return 0.5 * x * (1.0 + jnp.tanh(c * (x + 0.044715 * x * x * x)))


# -----------------------------------------------------------------------------
# Single fused kernel: embedding LN + L encoder layers + predictor MLP head.
# -----------------------------------------------------------------------------
def fused_forward_kernel(x_ref, bias_ref,
                         embg_ref, embb_ref,
                         wqkv_ref, bqkv_ref, wo_ref, bo_ref,
                         ln1g_ref, ln1b_ref,
                         w1_ref, b1_ref, w2_ref, b2_ref,
                         ln2g_ref, ln2b_ref,
                         hw1_ref, hb1_ref, hw2_ref, hb2_ref, hw3_ref, hb3_ref,
                         out_ref):
    x = x_ref[...]                  # (B*S, H) token + position embeddings
    bias = bias_ref[...]            # (B*S, B*S) additive attention bias (0 / -1e9)

    # Embedding LayerNorm (fused into the kernel).
    x = _layernorm(x, embg_ref[...], embb_ref[...])

    scale = 1.0 / math.sqrt(DH)
    col = jax.lax.broadcasted_iota(jnp.int32, (1, H), 1)   # lane indices 0..H-1

    for l in range(L):              # static unroll over encoder layers
        # Fused QKV projection: one (B*S, H) @ (H, 3H) MXU push.
        qkv = jnp.dot(x, wqkv_ref[l], preferred_element_type=jnp.float32) + bqkv_ref[l]
        q = qkv[:, 0:H]
        k = qkv[:, H:2 * H]
        v = qkv[:, 2 * H:3 * H]

        # Multi-head attention via head-column masks: per-head scores are exact
        # (zeros in the masked columns contribute nothing to the contraction),
        # and the context is assembled by summation -- no lane slicing / concat.
        ctx = jnp.zeros((BS, H), jnp.float32)
        for h in range(NUM_HEADS):  # static unroll over heads
            hm = ((col >= h * DH) & (col < (h + 1) * DH)).astype(jnp.float32)  # (1, H)
            s = jnp.einsum('qd,kd->qk', q * hm, k,
                           preferred_element_type=jnp.float32) * scale + bias
            s_max = jnp.max(s, axis=-1, keepdims=True)
            p = jnp.exp(s - s_max)
            p = p * pl.reciprocal(jnp.sum(p, axis=-1, keepdims=True), approx=True)
            ctx = ctx + jnp.dot(p, v * hm, preferred_element_type=jnp.float32)

        attn_out = jnp.dot(ctx, wo_ref[l], preferred_element_type=jnp.float32) + bo_ref[l]
        x = _layernorm(x + attn_out, ln1g_ref[l], ln1b_ref[l])

        ff = jnp.dot(x, w1_ref[l], preferred_element_type=jnp.float32) + b1_ref[l]
        ff = _gelu(ff)
        ff = jnp.dot(ff, w2_ref[l], preferred_element_type=jnp.float32) + b2_ref[l]
        x = _layernorm(x + ff, ln2g_ref[l], ln2b_ref[l])

    # [CLS] tokens: rows b*S of the flattened activations.
    cls = jnp.concatenate([x[b * S:b * S + 1, :] for b in range(B)], axis=0)   # (B, H)

    # Predictor MLP head (dropout = eval-mode identity).
    h1 = jnp.dot(cls, hw1_ref[...], preferred_element_type=jnp.float32) + hb1_ref[...]
    h1 = jnp.maximum(h1, 0.0)
    h2 = jnp.dot(h1, hw2_ref[...], preferred_element_type=jnp.float32) + hb2_ref[...]
    h2 = jnp.maximum(h2, 0.0)
    # Final projection is padded to OUT_PAD=128 lanes -> unmasked lane-dense store.
    out_ref[...] = jnp.dot(h2, hw3_ref[...], preferred_element_type=jnp.float32) + hb3_ref[...]


def _full(shape):
    return pl.BlockSpec(shape, lambda *_: (0,) * len(shape))


@jax.jit
def protein_transformer_forward(params, input_ids, attention_mask):
    # Embedding gather + position embeddings (plain-JAX glue; the token-id gather has
    # no clean rectangular BlockSpec at this size). Everything else runs in the kernel.
    x = jnp.take(params["word_emb"], input_ids, axis=0) + params["pos_emb"][None, :, :]
    x = x.reshape(BS, H).astype(jnp.float32)

    # Additive attention bias for the batch-flattened attention: -1e9 where the key is
    # a padded token or belongs to a different batch row, else 0.
    m = attention_mask.astype(jnp.float32).reshape(BS)
    batch_ids = jnp.repeat(jnp.arange(B, dtype=jnp.int32), S)
    keep = (batch_ids[:, None] == batch_ids[None, :]) & (m[None, :] > 0.5)
    attn_bias = jnp.where(keep, 0.0, -1e9).astype(jnp.float32)

    # Pad the final head projection to a lane-dense 128-wide output.
    hw3p = jnp.zeros((HEAD_H // 2, OUT_PAD), jnp.float32).at[:, :NUM_OUTPUTS].set(params["hw3"])
    hb3p = jnp.zeros((1, OUT_PAD), jnp.float32).at[:, :NUM_OUTPUTS].set(params["hb3"])

    in_specs = [
        _full((BS, H)),                                   # x
        _full((BS, BS)),                                  # attention bias
        _full((1, H)), _full((1, H)),                     # embedding LN gamma/beta
        _full((L, H, 3 * H)), _full((L, 1, 3 * H)),       # fused QKV weight/bias
        _full((L, H, H)), _full((L, 1, H)),               # attention output proj
        _full((L, 1, H)), _full((L, 1, H)),               # LN1 gamma/beta
        _full((L, H, FF)), _full((L, 1, FF)),             # FFN up
        _full((L, FF, H)), _full((L, 1, H)),              # FFN down
        _full((L, 1, H)), _full((L, 1, H)),               # LN2 gamma/beta
        _full((H, HEAD_H)), _full((1, HEAD_H)),           # head layer 1
        _full((HEAD_H, HEAD_H // 2)), _full((1, HEAD_H // 2)),  # head layer 2
        _full((HEAD_H // 2, OUT_PAD)), _full((1, OUT_PAD)),     # head layer 3 (padded)
    ]

    out = pl.pallas_call(
        fused_forward_kernel,
        out_shape=jax.ShapeDtypeStruct((B, OUT_PAD), jnp.float32),
        grid=(),
        in_specs=in_specs,
        out_specs=_full((B, OUT_PAD)),
    )(x, attn_bias,
      params["emb_ln_g"], params["emb_ln_b"],
      params["wqkv"], params["bqkv"], params["wo"], params["bo"],
      params["ln1g"], params["ln1b"],
      params["w1"], params["b1"], params["w2"], params["b2"],
      params["ln2g"], params["ln2b"],
      params["hw1"], params["hb1"], params["hw2"], params["hb2"],
      hw3p, hb3p)

    return out[:, :NUM_OUTPUTS]


# -----------------------------------------------------------------------------
# Deterministic parameter init (stacked per-layer weights) and a plain-JAX reference.
# -----------------------------------------------------------------------------
def init_params(key):
    def nrm(k, shape, scale=0.02):
        return scale * jax.random.normal(k, shape, dtype=jnp.float32)

    keys = iter(jax.random.split(key, 32))
    return {
        "word_emb": nrm(next(keys), (VOCAB, H)),
        "pos_emb": nrm(next(keys), (S, H)),
        "emb_ln_g": jnp.ones((1, H), jnp.float32),
        "emb_ln_b": jnp.zeros((1, H), jnp.float32),
        # encoder weights stacked along a leading L axis
        "wqkv": nrm(next(keys), (L, H, 3 * H)),
        "bqkv": jnp.zeros((L, 1, 3 * H), jnp.float32),
        "wo": nrm(next(keys), (L, H, H)),
        "bo": jnp.zeros((L, 1, H), jnp.float32),
        "ln1g": jnp.ones((L, 1, H), jnp.float32),
        "ln1b": jnp.zeros((L, 1, H), jnp.float32),
        "w1": nrm(next(keys), (L, H, FF)),
        "b1": jnp.zeros((L, 1, FF), jnp.float32),
        "w2": nrm(next(keys), (L, FF, H)),
        "b2": jnp.zeros((L, 1, H), jnp.float32),
        "ln2g": jnp.ones((L, 1, H), jnp.float32),
        "ln2b": jnp.zeros((L, 1, H), jnp.float32),
        # predictor head
        "hw1": nrm(next(keys), (H, HEAD_H), 0.1),
        "hb1": jnp.zeros((1, HEAD_H), jnp.float32),
        "hw2": nrm(next(keys), (HEAD_H, HEAD_H // 2), 0.1),
        "hb2": jnp.zeros((1, HEAD_H // 2), jnp.float32),
        "hw3": nrm(next(keys), (HEAD_H // 2, NUM_OUTPUTS), 0.1),
        "hb3": jnp.zeros((1, NUM_OUTPUTS), jnp.float32),
    }


def reference_forward(params, input_ids, attention_mask):
    def ln(x, g, b, eps=1e-12):
        mu = jnp.mean(x, -1, keepdims=True)
        var = jnp.mean((x - mu) ** 2, -1, keepdims=True)
        return (x - mu) * jax.lax.rsqrt(var + eps) * g + b

    x = jnp.take(params["word_emb"], input_ids, axis=0) + params["pos_emb"][None]
    x = ln(x, params["emb_ln_g"], params["emb_ln_b"])
    m = attention_mask.astype(jnp.float32)
    neg = (1.0 - m)[:, None, None, :] * (-1e9)
    for l in range(L):
        qkv = x @ params["wqkv"][l] + params["bqkv"][l]
        q, k, v = qkv[..., :H], qkv[..., H:2 * H], qkv[..., 2 * H:]
        split = lambda t: t.reshape(B, S, NUM_HEADS, DH).transpose(0, 2, 1, 3)
        qh, kh, vh = split(q), split(k), split(v)
        s = jnp.einsum('bhqd,bhkd->bhqk', qh, kh) / math.sqrt(DH) + neg
        p = jax.nn.softmax(s, axis=-1)
        ctx = jnp.einsum('bhqk,bhkd->bhqd', p, vh).transpose(0, 2, 1, 3).reshape(B, S, H)
        x = ln(x + ctx @ params["wo"][l] + params["bo"][l], params["ln1g"][l], params["ln1b"][l])
        ff = _gelu(x @ params["w1"][l] + params["b1"][l])
        x = ln(x + ff @ params["w2"][l] + params["b2"][l], params["ln2g"][l], params["ln2b"][l])
    cls = x[:, 0, :]
    h1 = jax.nn.relu(cls @ params["hw1"] + params["hb1"])
    h2 = jax.nn.relu(h1 @ params["hw2"] + params["hb2"])
    return h2 @ params["hw3"] + params["hb3"]


if __name__ == "__main__":
    key = jax.random.PRNGKey(0)
    pkey, ikey = jax.random.split(key)
    params = init_params(pkey)

    input_ids = jax.random.randint(ikey, (B, S), 0, VOCAB, dtype=jnp.int32)
    attention_mask = jnp.ones((B, S), dtype=jnp.int32).at[:, S - 2:].set(0)  # pad last 2 tokens

    out = protein_transformer_forward(params, input_ids, attention_mask)
    out = jax.block_until_ready(out)
    assert out.shape == (B, NUM_OUTPUTS), out.shape

    ref = reference_forward(params, input_ids, attention_mask)
    assert float(jnp.max(jnp.abs(out - ref))) < 1e-2

    print("KERNEL_OK")
</pallas_src>

<mosaic_0001>
module attributes {stable_mosaic.version = 11 : i64} {
  func.func @fused_forward_kernel(%arg0: memref<16x32xf32, #tpu.memory_space<vmem>>, %arg1: memref<16x16xf32, #tpu.memory_space<vmem>>, %arg2: memref<1x32xf32, #tpu.memory_space<vmem>>, %arg3: memref<1x32xf32, #tpu.memory_space<vmem>>, %arg4: memref<2x32x96xf32, #tpu.memory_space<vmem>>, %arg5: memref<2x1x96xf32, #tpu.memory_space<vmem>>, %arg6: memref<2x32x32xf32, #tpu.memory_space<vmem>>, %arg7: memref<2x1x32xf32, #tpu.memory_space<vmem>>, %arg8: memref<2x1x32xf32, #tpu.memory_space<vmem>>, %arg9: memref<2x1x32xf32, #tpu.memory_space<vmem>>, %arg10: memref<2x32x64xf32, #tpu.memory_space<vmem>>, %arg11: memref<2x1x64xf32, #tpu.memory_space<vmem>>, %arg12: memref<2x64x32xf32, #tpu.memory_space<vmem>>, %arg13: memref<2x1x32xf32, #tpu.memory_space<vmem>>, %arg14: memref<2x1x32xf32, #tpu.memory_space<vmem>>, %arg15: memref<2x1x32xf32, #tpu.memory_space<vmem>>, %arg16: memref<32x16xf32, #tpu.memory_space<vmem>>, %arg17: memref<1x16xf32, #tpu.memory_space<vmem>>, %arg18: memref<16x8xf32, #tpu.memory_space<vmem>>, %arg19: memref<1x8xf32, #tpu.memory_space<vmem>>, %arg20: memref<8x128xf32, #tpu.memory_space<vmem>>, %arg21: memref<1x128xf32, #tpu.memory_space<vmem>>, %arg22: memref<2x128xf32, #tpu.memory_space<vmem>>) attributes {dimension_semantics = [], scalar_prefetch = 0 : i64, scratch_operands = 0 : i64, tpu.core_type = #tpu.core_type<tc>} {
    %c0 = arith.constant 0 : index
    %c0_0 = arith.constant 0 : index
    %0 = vector.load %arg0[%c0, %c0_0] : memref<16x32xf32, #tpu.memory_space<vmem>>, vector<16x32xf32>
    %c0_1 = arith.constant 0 : index
    %c0_2 = arith.constant 0 : index
    %1 = vector.load %arg1[%c0_1, %c0_2] : memref<16x16xf32, #tpu.memory_space<vmem>>, vector<16x16xf32>
    %c0_3 = arith.constant 0 : index
    %c0_4 = arith.constant 0 : index
    %2 = vector.load %arg2[%c0_3, %c0_4] : memref<1x32xf32, #tpu.memory_space<vmem>>, vector<1x32xf32>
    %c0_5 = arith.constant 0 : index
    %c0_6 = arith.constant 0 : index
    %3 = vector.load %arg3[%c0_5, %c0_6] : memref<1x32xf32, #tpu.memory_space<vmem>>, vector<1x32xf32>
    %cst = arith.constant dense<0.000000e+00> : vector<16xf32>
    %4 = vector.multi_reduction <add>, %0, %cst [1] : vector<16x32xf32> to vector<16xf32>
    %5 = vector.shape_cast %4 : vector<16xf32> to vector<16x1xf32>
    %cst_7 = arith.constant 3.200000e+01 : f32
    %6 = vector.broadcast %cst_7 : f32 to vector<16x1xf32>
    %7 = arith.divf %5, %6 : vector<16x1xf32>
    %8 = vector.broadcast %7 : vector<16x1xf32> to vector<16x32xf32>
    %9 = arith.subf %0, %8 : vector<16x32xf32>
    %10 = arith.mulf %9, %9 : vector<16x32xf32>
    %cst_8 = arith.constant dense<0.000000e+00> : vector<16xf32>
    %11 = vector.multi_reduction <add>, %10, %cst_8 [1] : vector<16x32xf32> to vector<16xf32>
    %12 = vector.shape_cast %11 : vector<16xf32> to vector<16x1xf32>
    %cst_9 = arith.constant 3.200000e+01 : f32
    %13 = vector.broadcast %cst_9 : f32 to vector<16x1xf32>
    %14 = arith.divf %12, %13 : vector<16x1xf32>
    %15 = vector.broadcast %7 : vector<16x1xf32> to vector<16x32xf32>
    %16 = arith.subf %0, %15 : vector<16x32xf32>
    %cst_10 = arith.constant 9.99999996E-13 : f32
    %17 = vector.broadcast %cst_10 : f32 to vector<16x1xf32>
    %18 = arith.addf %14, %17 : vector<16x1xf32>
    %19 = math.rsqrt %18 : vector<16x1xf32>
    %20 = vector.broadcast %19 : vector<16x1xf32> to vector<16x32xf32>
    %21 = arith.mulf %16, %20 : vector<16x32xf32>
    %22 = vector.broadcast %2 : vector<1x32xf32> to vector<16x32xf32>
    %23 = arith.mulf %21, %22 : vector<16x32xf32>
    %24 = vector.broadcast %3 : vector<1x32xf32> to vector<16x32xf32>
    %25 = arith.addf %23, %24 : vector<16x32xf32>
    %26 = tpu.iota {dimensions = array<i32: 1>} : vector<1x32xi32>
    %c0_11 = arith.constant 0 : index
    %c0_12 = arith.constant 0 : index
    %c0_13 = arith.constant 0 : index
    %27 = vector.load %arg4[%c0_11, %c0_12, %c0_13] : memref<2x32x96xf32, #tpu.memory_space<vmem>>, vector<1x32x96xf32>
    %28 = vector.shape_cast %27 : vector<1x32x96xf32> to vector<32x96xf32>
    %cst_14 = arith.constant dense<0.000000e+00> : vector<16x96xf32>
    %29 = tpu.matmul %25, %28, %cst_14 {dimension_numbers = #tpu.dot_dimension_numbers<[1], [0], [0], [1], [0, 0, 1, 1], [], []>} : vector<16x32xf32>, vector<32x96xf32>, vector<16x96xf32> -> vector<16x96xf32>
    %c0_15 = arith.constant 0 : index
    %c0_16 = arith.constant 0 : index
    %c0_17 = arith.constant 0 : index
    %30 = vector.load %arg5[%c0_15, %c0_16, %c0_17] : memref<2x1x96xf32, #tpu.memory_space<vmem>>, vector<1x1x96xf32>
    %31 = vector.shape_cast %30 : vector<1x1x96xf32> to vector<1x96xf32>
    %32 = vector.broadcast %31 : vector<1x96xf32> to vector<16x96xf32>
    %33 = arith.addf %29, %32 : vector<16x96xf32>
    %34 = vector.extract_strided_slice %33 {offsets = [0, 0], sizes = [16, 32], strides = [1, 1]} : vector<16x96xf32> to vector<16x32xf32>
    %35 = vector.extract_strided_slice %33 {offsets = [0, 32], sizes = [16, 32], strides = [1, 1]} : vector<16x96xf32> to vector<16x32xf32>
    %36 = vector.extract_strided_slice %33 {offsets = [0, 64], sizes = [16, 32], strides = [1, 1]} : vector<16x96xf32> to vector<16x32xf32>
    %cst_18 = arith.constant 0.000000e+00 : f32
    %37 = vector.broadcast %cst_18 : f32 to vector<16x32xf32>
    %c0_i32 = arith.constant 0 : i32
    %38 = vector.broadcast %c0_i32 : i32 to vector<1x32xi32>
    %39 = arith.cmpi sge, %26, %38 : vector<1x32xi32>
    %c16_i32 = arith.constant 16 : i32
    %40 = vector.broadcast %c16_i32 : i32 to vector<1x32xi32>
    %41 = arith.cmpi slt, %26, %40 : vector<1x32xi32>
    %42 = arith.andi %39, %41 : vector<1x32xi1>
    %43 = arith.extui %42 : vector<1x32xi1> to vector<1x32xi32>
    %44 = arith.sitofp %43 : vector<1x32xi32> to vector<1x32xf32>
    %45 = vector.broadcast %44 : vector<1x32xf32> to vector<16x32xf32>
    %46 = arith.mulf %34, %45 : vector<16x32xf32>
    "tpu.trace_start"() <{level = 10 : i32, message = "qd,kd->qk"}> : () -> ()
    %cst_19 = arith.constant dense<0.000000e+00> : vector<16x16xf32>
    %47 = tpu.matmul %46, %35, %cst_19 {dimension_numbers = #tpu.dot_dimension_numbers<[1], [1], [0], [0], [0, 0, 1, 0], [], []>} : vector<16x32xf32>, vector<16x32xf32>, vector<16x16xf32> -> vector<16x16xf32>
    "tpu.trace_stop"() : () -> ()
    %cst_20 = arith.constant 2.500000e-01 : f32
    %48 = vector.broadcast %cst_20 : f32 to vector<16x16xf32>
    %49 = arith.mulf %47, %48 : vector<16x16xf32>
    %50 = arith.addf %49, %1 : vector<16x16xf32>
    %cst_21 = arith.constant dense<0xFF800000> : vector<16xf32>
    %51 = vector.multi_reduction <maximumf>, %50, %cst_21 [1] : vector<16x16xf32> to vector<16xf32>
    %52 = vector.shape_cast %51 : vector<16xf32> to vector<16x1xf32>
    %53 = vector.broadcast %52 : vector<16x1xf32> to vector<16x16xf32>
    %54 = arith.subf %50, %53 : vector<16x16xf32>
    %55 = math.exp %54 : vector<16x16xf32>
    %cst_22 = arith.constant dense<0.000000e+00> : vector<16xf32>
    %56 = vector.multi_reduction <add>, %55, %cst_22 [1] : vector<16x16xf32> to vector<16xf32>
    %57 = vector.shape_cast %56 : vector<16xf32> to vector<16x1xf32>
    %58 = tpu.reciprocal %57 {approx = true} : vector<16x1xf32> -> vector<16x1xf32>
    %59 = vector.broadcast %58 : vector<16x1xf32> to vector<16x16xf32>
    %60 = arith.mulf %55, %59 : vector<16x16xf32>
    %61 = vector.broadcast %44 : vector<1x32xf32> to vector<16x32xf32>
    %62 = arith.mulf %36, %61 : vector<16x32xf32>
    %cst_23 = arith.constant dense<0.000000e+00> : vector<16x32xf32>
    %63 = tpu.matmul %60, %62, %cst_23 {dimension_numbers = #tpu.dot_dimension_numbers<[1], [0], [0], [1], [0, 0, 1, 1], [], []>} : vector<16x16xf32>, vector<16x32xf32>, vector<16x32xf32> -> vector<16x32xf32>
    %64 = arith.addf %37, %63 : vector<16x32xf32>
    %c16_i32_24 = arith.constant 16 : i32
    %65 = vector.broadcast %c16_i32_24 : i32 to vector<1x32xi32>
    %66 = arith.cmpi sge, %26, %65 : vector<1x32xi32>
    %c32_i32 = arith.constant 32 : i32
    %67 = vector.broadcast %c32_i32 : i32 to vector<1x32xi32>
    %68 = arith.cmpi slt, %26, %67 : vector<1x32xi32>
    %69 = arith.andi %66, %68 : vector<1x32xi1>
    %70 = arith.extui %69 : vector<1x32xi1> to vector<1x32xi32>
    %71 = arith.sitofp %70 : vector<1x32xi32> to vector<1x32xf32>
    %72 = vector.broadcast %71 : vector<1x32xf32> to vector<16x32xf32>
    %73 = arith.mulf %34, %72 : vector<16x32xf32>
    "tpu.trace_start"() <{level = 10 : i32, message = "qd,kd->qk"}> : () -> ()
    %cst_25 = arith.constant dense<0.000000e+00> : vector<16x16xf32>
    %74 = tpu.matmul %73, %35, %cst_25 {dimension_numbers = #tpu.dot_dimension_numbers<[1], [1], [0], [0], [0, 0, 1, 0], [], []>} : vector<16x32xf32>, vector<16x32xf32>, vector<16x16xf32> -> vector<16x16xf32>
    "tpu.trace_stop"() : () -> ()
    %cst_26 = arith.constant 2.500000e-01 : f32
    %75 = vector.broadcast %cst_26 : f32 to vector<16x16xf32>
    %76 = arith.mulf %74, %75 : vector<16x16xf32>
    %77 = arith.addf %76, %1 : vector<16x16xf32>
    %cst_27 = arith.constant dense<0xFF800000> : vector<16xf32>
    %78 = vector.multi_reduction <maximumf>, %77, %cst_27 [1] : vector<16x16xf32> to vector<16xf32>
    %79 = vector.shape_cast %78 : vector<16xf32> to vector<16x1xf32>
    %80 = vector.broadcast %79 : vector<16x1xf32> to vector<16x16xf32>
    %81 = arith.subf %77, %80 : vector<16x16xf32>
    %82 = math.exp %81 : vector<16x16xf32>
    %cst_28 = arith.constant dense<0.000000e+00> : vector<16xf32>
    %83 = vector.multi_reduction <add>, %82, %cst_28 [1] : vector<16x16xf32> to vector<16xf32>
    %84 = vector.shape_cast %83 : vector<16xf32> to vector<16x1xf32>
    %85 = tpu.reciprocal %84 {approx = true} : vector<16x1xf32> -> vector<16x1xf32>
    %86 = vector.broadcast %85 : vector<16x1xf32> to vector<16x16xf32>
    %87 = arith.mulf %82, %86 : vector<16x16xf32>
    %88 = vector.broadcast %71 : vector<1x32xf32> to vector<16x32xf32>
    %89 = arith.mulf %36, %88 : vector<16x32xf32>
    %cst_29 = arith.constant dense<0.000000e+00> : vector<16x32xf32>
    %90 = tpu.matmul %87, %89, %cst_29 {dimension_numbers = #tpu.dot_dimension_numbers<[1], [0], [0], [1], [0, 0, 1, 1], [], []>} : vector<16x16xf32>, vector<16x32xf32>, vector<16x32xf32> -> vector<16x32xf32>
    %91 = arith.addf %64, %90 : vector<16x32xf32>
    %c0_30 = arith.constant 0 : index
    %c0_31 = arith.constant 0 : index
    %c0_32 = arith.constant 0 : index
    %92 = vector.load %arg6[%c0_30, %c0_31, %c0_32] : memref<2x32x32xf32, #tpu.memory_space<vmem>>, vector<1x32x32xf32>
    %93 = vector.shape_cast %92 : vector<1x32x32xf32> to vector<32x32xf32>
    %cst_33 = arith.constant dense<0.000000e+00> : vector<16x32xf32>
    %94 = tpu.matmul %91, %93, %cst_33 {dimension_numbers = #tpu.dot_dimension_numbers<[1], [0], [0], [1], [0, 0, 1, 1], [], []>} : vector<16x32xf32>, vector<32x32xf32>, vector<16x32xf32> -> vector<16x32xf32>
    %c0_34 = arith.constant 0 : index
    %c0_35 = arith.constant 0 : index
    %c0_36 = arith.constant 0 : index
    %95 = vector.load %arg7[%c0_34, %c0_35, %c0_36] : memref<2x1x32xf32, #tpu.memory_space<vmem>>, vector<1x1x32xf32>
    %96 = vector.shape_cast %95 : vector<1x1x32xf32> to vector<1x32xf32>
    %97 = vector.broadcast %96 : vector<1x32xf32> to vector<16x32xf32>
    %98 = arith.addf %94, %97 : vector<16x32xf32>
    %99 = arith.addf %25, %98 : vector<16x32xf32>
    %c0_37 = arith.constant 0 : index
    %c0_38 = arith.constant 0 : index
    %c0_39 = arith.constant 0 : index
    %100 = vector.load %arg8[%c0_37, %c0_38, %c0_39] : memref<2x1x32xf32, #tpu.memory_space<vmem>>, vector<1x1x32xf32>
    %101 = vector.shape_cast %100 : vector<1x1x32xf32> to vector<1x32xf32>
    %c0_40 = arith.constant 0 : index
    %c0_41 = arith.constant 0 : index
    %c0_42 = arith.constant 0 : index
    %102 = vector.load %arg9[%c0_40, %c0_41, %c0_42] : memref<2x1x32xf32, #tpu.memory_space<vmem>>, vector<1x1x32xf32>
    %103 = vector.shape_cast %102 : vector<1x1x32xf32> to vector<1x32xf32>
    %cst_43 = arith.constant dense<0.000000e+00> : vector<16xf32>
    %104 = vector.multi_reduction <add>, %99, %cst_43 [1] : vector<16x32xf32> to vector<16xf32>
    %105 = vector.shape_cast %104 : vector<16xf32> to vector<16x1xf32>
    %cst_44 = arith.constant 3.200000e+01 : f32
    %106 = vector.broadcast %cst_44 : f32 to vector<16x1xf32>
    %107 = arith.divf %105, %106 : vector<16x1xf32>
    %108 = vector.broadcast %107 : vector<16x1xf32> to vector<16x32xf32>
    %109 = arith.subf %99, %108 : vector<16x32xf32>
    %110 = arith.mulf %109, %109 : vector<16x32xf32>
    %cst_45 = arith.constant dense<0.000000e+00> : vector<16xf32>
    %111 = vector.multi_reduction <add>, %110, %cst_45 [1] : vector<16x32xf32> to vector<16xf32>
    %112 = vector.shape_cast %111 : vector<16xf32> to vector<16x1xf32>
    %cst_46 = arith.constant 3.200000e+01 : f32
    %113 = vector.broadcast %cst_46 : f32 to vector<16x1xf32>
    %114 = arith.divf %112, %113 : vector<16x1xf32>
    %115 = vector.broadcast %107 : vector<16x1xf32> to vector<16x32xf32>
    %116 = arith.subf %99, %115 : vector<16x32xf32>
    %cst_47 = arith.constant 9.99999996E-13 : f32
    %117 = vector.broadcast %cst_47 : f32 to vector<16x1xf32>
    %118 = arith.addf %114, %117 : vector<16x1xf32>
    %119 = math.rsqrt %118 : vector<16x1xf32>
    %120 = vector.broadcast %119 : vector<16x1xf32> to vector<16x32xf32>
    %121 = arith.mulf %116, %120 : vector<16x32xf32>
    %122 = vector.broadcast %101 : vector<1x32xf32> to vector<16x32xf32>
    %123 = arith.mulf %121, %122 : vector<16x32xf32>
    %124 = vector.broadcast %103 : vector<1x32xf32> to vector<16x32xf32>
    %125 = arith.addf %123, %124 : vector<16x32xf32>
    %c0_48 = arith.constant 0 : index
    %c0_49 = arith.constant 0 : index
    %c0_50 = arith.constant 0 : index
    %126 = vector.load %arg10[%c0_48, %c0_49, %c0_50] : memref<2x32x64xf32, #tpu.memory_space<vmem>>, vector<1x32x64xf32>
    %127 = vector.shape_cast %126 : vector<1x32x64xf32> to vector<32x64xf32>
    %cst_51 = arith.constant dense<0.000000e+00> : vector<16x64xf32>
    %128 = tpu.matmul %125, %127, %cst_51 {dimension_numbers = #tpu.dot_dimension_numbers<[1], [0], [0], [1], [0, 0, 1, 1], [], []>} : vector<16x32xf32>, vector<32x64xf32>, vector<16x64xf32> -> vector<16x64xf32>
    %c0_52 = arith.constant 0 : index
    %c0_53 = arith.constant 0 : index
    %c0_54 = arith.constant 0 : index
    %129 = vector.load %arg11[%c0_52, %c0_53, %c0_54] : memref<2x1x64xf32, #tpu.memory_space<vmem>>, vector<1x1x64xf32>
    %130 = vector.shape_cast %129 : vector<1x1x64xf32> to vector<1x64xf32>
    %131 = vector.broadcast %130 : vector<1x64xf32> to vector<16x64xf32>
    %132 = arith.addf %128, %131 : vector<16x64xf32>
    %cst_55 = arith.constant 5.000000e-01 : f32
    %133 = vector.broadcast %cst_55 : f32 to vector<16x64xf32>
    %134 = arith.mulf %133, %132 : vector<16x64xf32>
    %cst_56 = arith.constant 4.471500e-02 : f32
    %135 = vector.broadcast %cst_56 : f32 to vector<16x64xf32>
    %136 = arith.mulf %135, %132 : vector<16x64xf32>
    %137 = arith.mulf %136, %132 : vector<16x64xf32>
    %138 = arith.mulf %137, %132 : vector<16x64xf32>
    %139 = arith.addf %132, %138 : vector<16x64xf32>
    %cst_57 = arith.constant 0.797884583 : f32
    %140 = vector.broadcast %cst_57 : f32 to vector<16x64xf32>
    %141 = arith.mulf %140, %139 : vector<16x64xf32>
    %142 = math.tanh %141 : vector<16x64xf32>
    %cst_58 = arith.constant 1.000000e+00 : f32
    %143 = vector.broadcast %cst_58 : f32 to vector<16x64xf32>
    %144 = arith.addf %143, %142 : vector<16x64xf32>
    %145 = arith.mulf %134, %144 : vector<16x64xf32>
    %c0_59 = arith.constant 0 : index
    %c0_60 = arith.constant 0 : index
    %c0_61 = arith.constant 0 : index
    %146 = vector.load %arg12[%c0_59, %c0_60, %c0_61] : memref<2x64x32xf32, #tpu.memory_space<vmem>>, vector<1x64x32xf32>
    %147 = vector.shape_cast %146 : vector<1x64x32xf32> to vector<64x32xf32>
    %cst_62 = arith.constant dense<0.000000e+00> : vector<16x32xf32>
    %148 = tpu.matmul %145, %147, %cst_62 {dimension_numbers = #tpu.dot_dimension_numbers<[1], [0], [0], [1], [0, 0, 1, 1], [], []>} : vector<16x64xf32>, vector<64x32xf32>, vector<16x32xf32> -> vector<16x32xf32>
    %c0_63 = arith.constant 0 : index
    %c0_64 = arith.constant 0 : index
    %c0_65 = arith.constant 0 : index
    %149 = vector.load %arg13[%c0_63, %c0_64, %c0_65] : memref<2x1x32xf32, #tpu.memory_space<vmem>>, vector<1x1x32xf32>
    %150 = vector.shape_cast %149 : vector<1x1x32xf32> to vector<1x32xf32>
    %151 = vector.broadcast %150 : vector<1x32xf32> to vector<16x32xf32>
    %152 = arith.addf %148, %151 : vector<16x32xf32>
    %153 = arith.addf %125, %152 : vector<16x32xf32>
    %c0_66 = arith.constant 0 : index
    %c0_67 = arith.constant 0 : index
    %c0_68 = arith.constant 0 : index
    %154 = vector.load %arg14[%c0_66, %c0_67, %c0_68] : memref<2x1x32xf32, #tpu.memory_space<vmem>>, vector<1x1x32xf32>
    %155 = vector.shape_cast %154 : vector<1x1x32xf32> to vector<1x32xf32>
    %c0_69 = arith.constant 0 : index
    %c0_70 = arith.constant 0 : index
    %c0_71 = arith.constant 0 : index
    %156 = vector.load %arg15[%c0_69, %c0_70, %c0_71] : memref<2x1x32xf32, #tpu.memory_space<vmem>>, vector<1x1x32xf32>
    %157 = vector.shape_cast %156 : vector<1x1x32xf32> to vector<1x32xf32>
    %cst_72 = arith.constant dense<0.000000e+00> : vector<16xf32>
    %158 = vector.multi_reduction <add>, %153, %cst_72 [1] : vector<16x32xf32> to vector<16xf32>
    %159 = vector.shape_cast %158 : vector<16xf32> to vector<16x1xf32>
    %cst_73 = arith.constant 3.200000e+01 : f32
    %160 = vector.broadcast %cst_73 : f32 to vector<16x1xf32>
    %161 = arith.divf %159, %160 : vector<16x1xf32>
    %162 = vector.broadcast %161 : vector<16x1xf32> to vector<16x32xf32>
    %163 = arith.subf %153, %162 : vector<16x32xf32>
    %164 = arith.mulf %163, %163 : vector<16x32xf32>
    %cst_74 = arith.constant dense<0.000000e+00> : vector<16xf32>
    %165 = vector.multi_reduction <add>, %164, %cst_74 [1] : vector<16x32xf32> to vector<16xf32>
    %166 = vector.shape_cast %165 : vector<16xf32> to vector<16x1xf32>
    %cst_75 = arith.constant 3.200000e+01 : f32
    %167 = vector.broadcast %cst_75 : f32 to vector<16x1xf32>
    %168 = arith.divf %166, %167 : vector<16x1xf32>
    %169 = vector.broadcast %161 : vector<16x1xf32> to vector<16x32xf32>
    %170 = arith.subf %153, %169 : vector<16x32xf32>
    %cst_76 = arith.constant 9.99999996E-13 : f32
    %171 = vector.broadcast %cst_76 : f32 to vector<16x1xf32>
    %172 = arith.addf %168, %171 : vector<16x1xf32>
    %173 = math.rsqrt %172 : vector<16x1xf32>
    %174 = vector.broadcast %173 : vector<16x1xf32> to vector<16x32xf32>
    %175 = arith.mulf %170, %174 : vector<16x32xf32>
    %176 = vector.broadcast %155 : vector<1x32xf32> to vector<16x32xf32>
    %177 = arith.mulf %175, %176 : vector<16x32xf32>
    %178 = vector.broadcast %157 : vector<1x32xf32> to vector<16x32xf32>
    %179 = arith.addf %177, %178 : vector<16x32xf32>
    %c1 = arith.constant 1 : index
    %c0_77 = arith.constant 0 : index
    %c0_78 = arith.constant 0 : index
    %180 = vector.load %arg4[%c1, %c0_77, %c0_78] : memref<2x32x96xf32, #tpu.memory_space<vmem>>, vector<1x32x96xf32>
    %181 = vector.shape_cast %180 : vector<1x32x96xf32> to vector<32x96xf32>
    %cst_79 = arith.constant dense<0.000000e+00> : vector<16x96xf32>
    %182 = tpu.matmul %179, %181, %cst_79 {dimension_numbers = #tpu.dot_dimension_numbers<[1], [0], [0], [1], [0, 0, 1, 1], [], []>} : vector<16x32xf32>, vector<32x96xf32>, vector<16x96xf32> -> vector<16x96xf32>
    %c1_80 = arith.constant 1 : index
    %c0_81 = arith.constant 0 : index
    %c0_82 = arith.constant 0 : index
    %183 = vector.load %arg5[%c1_80, %c0_81, %c0_82] : memref<2x1x96xf32, #tpu.memory_space<vmem>>, vector<1x1x96xf32>
    %184 = vector.shape_cast %183 : vector<1x1x96xf32> to vector<1x96xf32>
    %185 = vector.broadcast %184 : vector<1x96xf32> to vector<16x96xf32>
    %186 = arith.addf %182, %185 : vector<16x96xf32>
    %187 = vector.extract_strided_slice %186 {offsets = [0, 0], sizes = [16, 32], strides = [1, 1]} : vector<16x96xf32> to vector<16x32xf32>
    %188 = vector.extract_strided_slice %186 {offsets = [0, 32], sizes = [16, 32], strides = [1, 1]} : vector<16x96xf32> to vector<16x32xf32>
    %189 = vector.extract_strided_slice %186 {offsets = [0, 64], sizes = [16, 32], strides = [1, 1]} : vector<16x96xf32> to vector<16x32xf32>
    %cst_83 = arith.constant 0.000000e+00 : f32
    %190 = vector.broadcast %cst_83 : f32 to vector<16x32xf32>
    %c0_i32_84 = arith.constant 0 : i32
    %191 = vector.broadcast %c0_i32_84 : i32 to vector<1x32xi32>
    %192 = arith.cmpi sge, %26, %191 : vector<1x32xi32>
    %c16_i32_85 = arith.constant 16 : i32
    %193 = vector.broadcast %c16_i32_85 : i32 to vector<1x32xi32>
    %194 = arith.cmpi slt, %26, %193 : vector<1x32xi32>
    %195 = arith.andi %192, %194 : vector<1x32xi1>
    %196 = arith.extui %195 : vector<1x32xi1> to vector<1x32xi32>
    %197 = arith.sitofp %196 : vector<1x32xi32> to vector<1x32xf32>
    %198 = vector.broadcast %197 : vector<1x32xf32> to vector<16x32xf32>
    %199 = arith.mulf %187, %198 : vector<16x32xf32>
    "tpu.trace_start"() <{level = 10 : i32, message = "qd,kd->qk"}> : () -> ()
    %cst_86 = arith.constant dense<0.000000e+00> : vector<16x16xf32>
    %200 = tpu.matmul %199, %188, %cst_86 {dimension_numbers = #tpu.dot_dimension_numbers<[1], [1], [0], [0], [0, 0, 1, 0], [], []>} : vector<16x32xf32>, vector<16x32xf32>, vector<16x16xf32> -> vector<16x16xf32>
    "tpu.trace_stop"() : () -> ()
    %cst_87 = arith.constant 2.500000e-01 : f32
    %201 = vector.broadcast %cst_87 : f32 to vector<16x16xf32>
    %202 = arith.mulf %200, %201 : vector<16x16xf32>
    %203 = arith.addf %202, %1 : vector<16x16xf32>
    %cst_88 = arith.constant dense<0xFF800000> : vector<16xf32>
    %204 = vector.multi_reduction <maximumf>, %203, %cst_88 [1] : vector<16x16xf32> to vector<16xf32>
    %205 = vector.shape_cast %204 : vector<16xf32> to vector<16x1xf32>
    %206 = vector.broadcast %205 : vector<16x1xf32> to vector<16x16xf32>
    %207 = arith.subf %203, %206 : vector<16x16xf32>
    %208 = math.exp %207 : vector<16x16xf32>
    %cst_89 = arith.constant dense<0.000000e+00> : vector<16xf32>
    %209 = vector.multi_reduction <add>, %208, %cst_89 [1] : vector<16x16xf32> to vector<16xf32>
    %210 = vector.shape_cast %209 : vector<16xf32> to vector<16x1xf32>
    %211 = tpu.reciprocal %210 {approx = true} : vector<16x1xf32> -> vector<16x1xf32>
    %212 = vector.broadcast %211 : vector<16x1xf32> to vector<16x16xf32>
    %213 = arith.mulf %208, %212 : vector<16x16xf32>
    %214 = vector.broadcast %197 : vector<1x32xf32> to vector<16x32xf32>
    %215 = arith.mulf %189, %214 : vector<16x32xf32>
    %cst_90 = arith.constant dense<0.000000e+00> : vector<16x32xf32>
    %216 = tpu.matmul %213, %215, %cst_90 {dimension_numbers = #tpu.dot_dimension_numbers<[1], [0], [0], [1], [0, 0, 1, 1], [], []>} : vector<16x16xf32>, vector<16x32xf32>, vector<16x32xf32> -> vector<16x32xf32>
    %217 = arith.addf %190, %216 : vector<16x32xf32>
    %c16_i32_91 = arith.constant 16 : i32
    %218 = vector.broadcast %c16_i32_91 : i32 to vector<1x32xi32>
    %219 = arith.cmpi sge, %26, %218 : vector<1x32xi32>
    %c32_i32_92 = arith.constant 32 : i32
    %220 = vector.broadcast %c32_i32_92 : i32 to vector<1x32xi32>
    %221 = arith.cmpi slt, %26, %220 : vector<1x32xi32>
    %222 = arith.andi %219, %221 : vector<1x32xi1>
    %223 = arith.extui %222 : vector<1x32xi1> to vector<1x32xi32>
    %224 = arith.sitofp %223 : vector<1x32xi32> to vector<1x32xf32>
    %225 = vector.broadcast %224 : vector<1x32xf32> to vector<16x32xf32>
    %226 = arith.mulf %187, %225 : vector<16x32xf32>
    "tpu.trace_start"() <{level = 10 : i32, message = "qd,kd->qk"}> : () -> ()
    %cst_93 = arith.constant dense<0.000000e+00> : vector<16x16xf32>
    %227 = tpu.matmul %226, %188, %cst_93 {dimension_numbers = #tpu.dot_dimension_numbers<[1], [1], [0], [0], [0, 0, 1, 0], [], []>} : vector<16x32xf32>, vector<16x32xf32>, vector<16x16xf32> -> vector<16x16xf32>
    "tpu.trace_stop"() : () -> ()
    %cst_94 = arith.constant 2.500000e-01 : f32
    %228 = vector.broadcast %cst_94 : f32 to vector<16x16xf32>
    %229 = arith.mulf %227, %228 : vector<16x16xf32>
    %230 = arith.addf %229, %1 : vector<16x16xf32>
    %cst_95 = arith.constant dense<0xFF800000> : vector<16xf32>
    %231 = vector.multi_reduction <maximumf>, %230, %cst_95 [1] : vector<16x16xf32> to vector<16xf32>
    %232 = vector.shape_cast %231 : vector<16xf32> to vector<16x1xf32>
    %233 = vector.broadcast %232 : vector<16x1xf32> to vector<16x16xf32>
    %234 = arith.subf %230, %233 : vector<16x16xf32>
    %235 = math.exp %234 : vector<16x16xf32>
    %cst_96 = arith.constant dense<0.000000e+00> : vector<16xf32>
    %236 = vector.multi_reduction <add>, %235, %cst_96 [1] : vector<16x16xf32> to vector<16xf32>
    %237 = vector.shape_cast %236 : vector<16xf32> to vector<16x1xf32>
    %238 = tpu.reciprocal %237 {approx = true} : vector<16x1xf32> -> vector<16x1xf32>
    %239 = vector.broadcast %238 : vector<16x1xf32> to vector<16x16xf32>
    %240 = arith.mulf %235, %239 : vector<16x16xf32>
    %241 = vector.broadcast %224 : vector<1x32xf32> to vector<16x32xf32>
    %242 = arith.mulf %189, %241 : vector<16x32xf32>
    %cst_97 = arith.constant dense<0.000000e+00> : vector<16x32xf32>
    %243 = tpu.matmul %240, %242, %cst_97 {dimension_numbers = #tpu.dot_dimension_numbers<[1], [0], [0], [1], [0, 0, 1, 1], [], []>} : vector<16x16xf32>, vector<16x32xf32>, vector<16x32xf32> -> vector<16x32xf32>
    %244 = arith.addf %217, %243 : vector<16x32xf32>
    %c1_98 = arith.constant 1 : index
    %c0_99 = arith.constant 0 : index
    %c0_100 = arith.constant 0 : index
    %245 = vector.load %arg6[%c1_98, %c0_99, %c0_100] : memref<2x32x32xf32, #tpu.memory_space<vmem>>, vector<1x32x32xf32>
    %246 = vector.shape_cast %245 : vector<1x32x32xf32> to vector<32x32xf32>
    %cst_101 = arith.constant dense<0.000000e+00> : vector<16x32xf32>
    %247 = tpu.matmul %244, %246, %cst_101 {dimension_numbers = #tpu.dot_dimension_numbers<[1], [0], [0], [1], [0, 0, 1, 1], [], []>} : vector<16x32xf32>, vector<32x32xf32>, vector<16x32xf32> -> vector<16x32xf32>
    %c1_102 = arith.constant 1 : index
    %c0_103 = arith.constant 0 : index
    %c0_104 = arith.constant 0 : index
    %248 = vector.load %arg7[%c1_102, %c0_103, %c0_104] : memref<2x1x32xf32, #tpu.memory_space<vmem>>, vector<1x1x32xf32>
    %249 = vector.shape_cast %248 : vector<1x1x32xf32> to vector<1x32xf32>
    %250 = vector.broadcast %249 : vector<1x32xf32> to vector<16x32xf32>
    %251 = arith.addf %247, %250 : vector<16x32xf32>
    %252 = arith.addf %179, %251 : vector<16x32xf32>
    %c1_105 = arith.constant 1 : index
    %c0_106 = arith.constant 0 : index
    %c0_107 = arith.constant 0 : index
    %253 = vector.load %arg8[%c1_105, %c0_106, %c0_107] : memref<2x1x32xf32, #tpu.memory_space<vmem>>, vector<1x1x32xf32>
    %254 = vector.shape_cast %253 : vector<1x1x32xf32> to vector<1x32xf32>
    %c1_108 = arith.constant 1 : index
    %c0_109 = arith.constant 0 : index
    %c0_110 = arith.constant 0 : index
    %255 = vector.load %arg9[%c1_108, %c0_109, %c0_110] : memref<2x1x32xf32, #tpu.memory_space<vmem>>, vector<1x1x32xf32>
    %256 = vector.shape_cast %255 : vector<1x1x32xf32> to vector<1x32xf32>
    %cst_111 = arith.constant dense<0.000000e+00> : vector<16xf32>
    %257 = vector.multi_reduction <add>, %252, %cst_111 [1] : vector<16x32xf32> to vector<16xf32>
    %258 = vector.shape_cast %257 : vector<16xf32> to vector<16x1xf32>
    %cst_112 = arith.constant 3.200000e+01 : f32
    %259 = vector.broadcast %cst_112 : f32 to vector<16x1xf32>
    %260 = arith.divf %258, %259 : vector<16x1xf32>
    %261 = vector.broadcast %260 : vector<16x1xf32> to vector<16x32xf32>
    %262 = arith.subf %252, %261 : vector<16x32xf32>
    %263 = arith.mulf %262, %262 : vector<16x32xf32>
    %cst_113 = arith.constant dense<0.000000e+00> : vector<16xf32>
    %264 = vector.multi_reduction <add>, %263, %cst_113 [1] : vector<16x32xf32> to vector<16xf32>
    %265 = vector.shape_cast %264 : vector<16xf32> to vector<16x1xf32>
    %cst_114 = arith.constant 3.200000e+01 : f32
    %266 = vector.broadcast %cst_114 : f32 to vector<16x1xf32>
    %267 = arith.divf %265, %266 : vector<16x1xf32>
    %268 = vector.broadcast %260 : vector<16x1xf32> to vector<16x32xf32>
    %269 = arith.subf %252, %268 : vector<16x32xf32>
    %cst_115 = arith.constant 9.99999996E-13 : f32
    %270 = vector.broadcast %cst_115 : f32 to vector<16x1xf32>
    %271 = arith.addf %267, %270 : vector<16x1xf32>
    %272 = math.rsqrt %271 : vector<16x1xf32>
    %273 = vector.broadcast %272 : vector<16x1xf32> to vector<16x32xf32>
    %274 = arith.mulf %269, %273 : vector<16x32xf32>
    %275 = vector.broadcast %254 : vector<1x32xf32> to vector<16x32xf32>
    %276 = arith.mulf %274, %275 : vector<16x32xf32>
    %277 = vector.broadcast %256 : vector<1x32xf32> to vector<16x32xf32>
    %278 = arith.addf %276, %277 : vector<16x32xf32>
    %c1_116 = arith.constant 1 : index
    %c0_117 = arith.constant 0 : index
    %c0_118 = arith.constant 0 : index
    %279 = vector.load %arg10[%c1_116, %c0_117, %c0_118] : memref<2x32x64xf32, #tpu.memory_space<vmem>>, vector<1x32x64xf32>
    %280 = vector.shape_cast %279 : vector<1x32x64xf32> to vector<32x64xf32>
    %cst_119 = arith.constant dense<0.000000e+00> : vector<16x64xf32>
    %281 = tpu.matmul %278, %280, %cst_119 {dimension_numbers = #tpu.dot_dimension_numbers<[1], [0], [0], [1], [0, 0, 1, 1], [], []>} : vector<16x32xf32>, vector<32x64xf32>, vector<16x64xf32> -> vector<16x64xf32>
    %c1_120 = arith.constant 1 : index
    %c0_121 = arith.constant 0 : index
    %c0_122 = arith.constant 0 : index
    %282 = vector.load %arg11[%c1_120, %c0_121, %c0_122] : memref<2x1x64xf32, #tpu.memory_space<vmem>>, vector<1x1x64xf32>
    %283 = vector.shape_cast %282 : vector<1x1x64xf32> to vector<1x64xf32>
    %284 = vector.broadcast %283 : vector<1x64xf32> to vector<16x64xf32>
    %285 = arith.addf %281, %284 : vector<16x64xf32>
    %cst_123 = arith.constant 5.000000e-01 : f32
    %286 = vector.broadcast %cst_123 : f32 to vector<16x64xf32>
    %287 = arith.mulf %286, %285 : vector<16x64xf32>
    %cst_124 = arith.constant 4.471500e-02 : f32
    %288 = vector.broadcast %cst_124 : f32 to vector<16x64xf32>
    %289 = arith.mulf %288, %285 : vector<16x64xf32>
    %290 = arith.mulf %289, %285 : vector<16x64xf32>
    %291 = arith.mulf %290, %285 : vector<16x64xf32>
    %292 = arith.addf %285, %291 : vector<16x64xf32>
    %cst_125 = arith.constant 0.797884583 : f32
    %293 = vector.broadcast %cst_125 : f32 to vector<16x64xf32>
    %294 = arith.mulf %293, %292 : vector<16x64xf32>
    %295 = math.tanh %294 : vector<16x64xf32>
    %cst_126 = arith.constant 1.000000e+00 : f32
    %296 = vector.broadcast %cst_126 : f32 to vector<16x64xf32>
    %297 = arith.addf %296, %295 : vector<16x64xf32>
    %298 = arith.mulf %287, %297 : vector<16x64xf32>
    %c1_127 = arith.constant 1 : index
    %c0_128 = arith.constant 0 : index
    %c0_129 = arith.constant 0 : index
    %299 = vector.load %arg12[%c1_127, %c0_128, %c0_129] : memref<2x64x32xf32, #tpu.memory_space<vmem>>, vector<1x64x32xf32>
    %300 = vector.shape_cast %299 : vector<1x64x32xf32> to vector<64x32xf32>
    %cst_130 = arith.constant dense<0.000000e+00> : vector<16x32xf32>
    %301 = tpu.matmul %298, %300, %cst_130 {dimension_numbers = #tpu.dot_dimension_numbers<[1], [0], [0], [1], [0, 0, 1, 1], [], []>} : vector<16x64xf32>, vector<64x32xf32>, vector<16x32xf32> -> vector<16x32xf32>
    %c1_131 = arith.constant 1 : index
    %c0_132 = arith.constant 0 : index
    %c0_133 = arith.constant 0 : index
    %302 = vector.load %arg13[%c1_131, %c0_132, %c0_133] : memref<2x1x32xf32, #tpu.memory_space<vmem>>, vector<1x1x32xf32>
    %303 = vector.shape_cast %302 : vector<1x1x32xf32> to vector<1x32xf32>
    %304 = vector.broadcast %303 : vector<1x32xf32> to vector<16x32xf32>
    %305 = arith.addf %301, %304 : vector<16x32xf32>
    %306 = arith.addf %278, %305 : vector<16x32xf32>
    %c1_134 = arith.constant 1 : index
    %c0_135 = arith.constant 0 : index
    %c0_136 = arith.constant 0 : index
    %307 = vector.load %arg14[%c1_134, %c0_135, %c0_136] : memref<2x1x32xf32, #tpu.memory_space<vmem>>, vector<1x1x32xf32>
    %308 = vector.shape_cast %307 : vector<1x1x32xf32> to vector<1x32xf32>
    %c1_137 = arith.constant 1 : index
    %c0_138 = arith.constant 0 : index
    %c0_139 = arith.constant 0 : index
    %309 = vector.load %arg15[%c1_137, %c0_138, %c0_139] : memref<2x1x32xf32, #tpu.memory_space<vmem>>, vector<1x1x32xf32>
    %310 = vector.shape_cast %309 : vector<1x1x32xf32> to vector<1x32xf32>
    %cst_140 = arith.constant dense<0.000000e+00> : vector<16xf32>
    %311 = vector.multi_reduction <add>, %306, %cst_140 [1] : vector<16x32xf32> to vector<16xf32>
    %312 = vector.shape_cast %311 : vector<16xf32> to vector<16x1xf32>
    %cst_141 = arith.constant 3.200000e+01 : f32
    %313 = vector.broadcast %cst_141 : f32 to vector<16x1xf32>
    %314 = arith.divf %312, %313 : vector<16x1xf32>
    %315 = vector.broadcast %314 : vector<16x1xf32> to vector<16x32xf32>
    %316 = arith.subf %306, %315 : vector<16x32xf32>
    %317 = arith.mulf %316, %316 : vector<16x32xf32>
    %cst_142 = arith.constant dense<0.000000e+00> : vector<16xf32>
    %318 = vector.multi_reduction <add>, %317, %cst_142 [1] : vector<16x32xf32> to vector<16xf32>
    %319 = vector.shape_cast %318 : vector<16xf32> to vector<16x1xf32>
    %cst_143 = arith.constant 3.200000e+01 : f32
    %320 = vector.broadcast %cst_143 : f32 to vector<16x1xf32>
    %321 = arith.divf %319, %320 : vector<16x1xf32>
    %322 = vector.broadcast %314 : vector<16x1xf32> to vector<16x32xf32>
    %323 = arith.subf %306, %322 : vector<16x32xf32>
    %cst_144 = arith.constant 9.99999996E-13 : f32
    %324 = vector.broadcast %cst_144 : f32 to vector<16x1xf32>
    %325 = arith.addf %321, %324 : vector<16x1xf32>
    %326 = math.rsqrt %325 : vector<16x1xf32>
    %327 = vector.broadcast %326 : vector<16x1xf32> to vector<16x32xf32>
    %328 = arith.mulf %323, %327 : vector<16x32xf32>
    %329 = vector.broadcast %308 : vector<1x32xf32> to vector<16x32xf32>
    %330 = arith.mulf %328, %329 : vector<16x32xf32>
    %331 = vector.broadcast %310 : vector<1x32xf32> to vector<16x32xf32>
    %332 = arith.addf %330, %331 : vector<16x32xf32>
    %333 = vector.extract_strided_slice %332 {offsets = [0, 0], sizes = [1, 32], strides = [1, 1]} : vector<16x32xf32> to vector<1x32xf32>
    %334 = vector.extract_strided_slice %332 {offsets = [8, 0], sizes = [1, 32], strides = [1, 1]} : vector<16x32xf32> to vector<1x32xf32>
    %335 = tpu.concatenate %333, %334 in 0 : vector<1x32xf32>, vector<1x32xf32> -> vector<2x32xf32>
    %c0_145 = arith.constant 0 : index
    %c0_146 = arith.constant 0 : index
    %336 = vector.load %arg16[%c0_145, %c0_146] : memref<32x16xf32, #tpu.memory_space<vmem>>, vector<32x16xf32>
    %cst_147 = arith.constant dense<0.000000e+00> : vector<2x16xf32>
    %337 = tpu.matmul %335, %336, %cst_147 {dimension_numbers = #tpu.dot_dimension_numbers<[1], [0], [0], [1], [0, 0, 1, 1], [], []>} : vector<2x32xf32>, vector<32x16xf32>, vector<2x16xf32> -> vector<2x16xf32>
    %c0_148 = arith.constant 0 : index
    %c0_149 = arith.constant 0 : index
    %338 = vector.load %arg17[%c0_148, %c0_149] : memref<1x16xf32, #tpu.memory_space<vmem>>, vector<1x16xf32>
    %339 = vector.broadcast %338 : vector<1x16xf32> to vector<2x16xf32>
    %340 = arith.addf %337, %339 : vector<2x16xf32>
    %cst_150 = arith.constant 0.000000e+00 : f32
    %341 = vector.broadcast %cst_150 : f32 to vector<2x16xf32>
    %342 = arith.maximumf %340, %341 : vector<2x16xf32>
    %c0_151 = arith.constant 0 : index
    %c0_152 = arith.constant 0 : index
    %343 = vector.load %arg18[%c0_151, %c0_152] : memref<16x8xf32, #tpu.memory_space<vmem>>, vector<16x8xf32>
    %cst_153 = arith.constant dense<0.000000e+00> : vector<2x8xf32>
    %344 = tpu.matmul %342, %343, %cst_153 {dimension_numbers = #tpu.dot_dimension_numbers<[1], [0], [0], [1], [0, 0, 1, 1], [], []>} : vector<2x16xf32>, vector<16x8xf32>, vector<2x8xf32> -> vector<2x8xf32>
    %c0_154 = arith.constant 0 : index
    %c0_155 = arith.constant 0 : index
    %345 = vector.load %arg19[%c0_154, %c0_155] : memref<1x8xf32, #tpu.memory_space<vmem>>, vector<1x8xf32>
    %346 = vector.broadcast %345 : vector<1x8xf32> to vector<2x8xf32>
    %347 = arith.addf %344, %346 : vector<2x8xf32>
    %cst_156 = arith.constant 0.000000e+00 : f32
    %348 = vector.broadcast %cst_156 : f32 to vector<2x8xf32>
    %349 = arith.maximumf %347, %348 : vector<2x8xf32>
    %c0_157 = arith.constant 0 : index
    %c0_158 = arith.constant 0 : index
    %350 = vector.load %arg20[%c0_157, %c0_158] : memref<8x128xf32, #tpu.memory_space<vmem>>, vector<8x128xf32>
    %cst_159 = arith.constant dense<0.000000e+00> : vector<2x128xf32>
    %351 = tpu.matmul %349, %350, %cst_159 {dimension_numbers = #tpu.dot_dimension_numbers<[1], [0], [0], [1], [0, 0, 1, 1], [], []>} : vector<2x8xf32>, vector<8x128xf32>, vector<2x128xf32> -> vector<2x128xf32>
    %c0_160 = arith.constant 0 : index
    %c0_161 = arith.constant 0 : index
    %352 = vector.load %arg21[%c0_160, %c0_161] : memref<1x128xf32, #tpu.memory_space<vmem>>, vector<1x128xf32>
    %353 = vector.broadcast %352 : vector<1x128xf32> to vector<2x128xf32>
    %354 = arith.addf %351, %353 : vector<2x128xf32>
    %c0_162 = arith.constant 0 : index
    %c0_163 = arith.constant 0 : index
    %355 = vector.load %arg22[%c0_162, %c0_163] : memref<2x128xf32, #tpu.memory_space<vmem>>, vector<2x128xf32>
    tpu.vector_store %arg22[%c0_162, %c0_163], %354 {strides = array<i32>} : memref<2x128xf32, #tpu.memory_space<vmem>>, vector<2x128xf32>,
    return
  }
}

</mosaic_0001>

<bundles_post_ra>
// kernel: protein_transformer_forward.1
= control target key start
LH: loop header
LB: loop body
LE: loop exit
PB: predicated region body
PF: predicated region fallthrough
CT: control target
= control target key end

     0   :  { %vm77_vm0 = vcmask 261120   ;;  %v121_v36 = vlaneseq  ;;  %v2802_v42 = vmov 0.0   ;;  %s2803_s24 = smov 96   ;;  %vm317_vm6 = vcmask 130048   ;;  %s3330_s0 = inlined_call_operand.vmem [shape: f32[16,32], index: 0, kind: input, shape index: {}]   ;;  %s3331_s4 = inlined_call_operand.vmem [shape: f32[2,32,96], index: 4, kind: input, shape index: {}]   ;;  %s3332_s2 = inlined_call_operand.vmem [shape: f32[1,32], index: 2, kind: input, shape index: {}]   ;;  %s3333_s3 = inlined_call_operand.vmem [shape: f32[1,32], index: 3, kind: input, shape index: {}]   ;;  %s3334_s5 = inlined_call_operand.vmem [shape: f32[2,1,96], index: 5, kind: input, shape index: {}]   ;;  %s3335_s1 = inlined_call_operand.vmem [shape: f32[16,16], index: 1, kind: input, shape index: {}]   ;;  %s3336_s6 = inlined_call_operand.vmem [shape: f32[2,32,32], index: 6, kind: input, shape index: {}]   ;;  %s3337_s7 = inlined_call_operand.vmem [shape: f32[2,1,32], index: 7, kind: input, shape index: {}]   ;;  %s3338_s10 = inlined_call_operand.vmem [shape: f32[2,32,64], index: 10, kind: input, shape index: {}]   ;;  %s3339_s8 = inlined_call_operand.vmem [shape: f32[2,1,32], index: 8, kind: input, shape index: {}]   ;;  %s3340_s9 = inlined_call_operand.vmem [shape: f32[2,1,32], index: 9, kind: input, shape index: {}]   ;;  %s3341_s12 = inlined_call_operand.vmem [shape: f32[2,64,32], index: 12, kind: input, shape index: {}]   ;;  %s3342_s11 = inlined_call_operand.vmem [shape: f32[2,1,64], index: 11, kind: input, shape index: {}]   ;;  %s3343_s13 = inlined_call_operand.vmem [shape: f32[2,1,32], index: 13, kind: input, shape index: {}]   ;;  %s3344_s14 = inlined_call_operand.vmem [shape: f32[2,1,32], index: 14, kind: input, shape index: {}]   ;;  %s3345_s15 = inlined_call_operand.vmem [shape: f32[2,1,32], index: 15, kind: input, shape index: {}]   ;;  %s3346_s16 = inlined_call_operand.vmem [shape: f32[32,16], index: 16, kind: input, shape index: {}]   ;;  %s3347_s18 = inlined_call_operand.vmem [shape: f32[16,8], index: 18, kind: input, shape index: {}]   ;;  %s3348_s17 = inlined_call_operand.vmem [shape: f32[1,16], index: 17, kind: input, shape index: {}]   ;;  %s3349_s20 = inlined_call_operand.vmem [shape: f32[8,128], index: 20, kind: input, shape index: {}]   ;;  %s3350_s19 = inlined_call_operand.vmem [shape: f32[1,8], index: 19, kind: input, shape index: {}]   ;;  %s3351_s21 = inlined_call_operand.vmem [shape: f32[1,128], index: 21, kind: input, shape index: {}]   ;;  %s3352_s22 = inlined_call_operand.vmem [shape: f32[2,128], index: 22, kind: output, shape index: {}]  }
   0x1   :  { %3358 = sst [smem:[#allocation2_spill]] %s3330_s0  ;;  %vm2984_vm5 = vmpackc.low %vm77_vm0, %vm77_vm0  ;;  %vm907_vm7 = vcmask 523264   ;;  %vm2806_vm8 = vmmov 0   ;;  %vm1942_vm9 = vcmask 1040384   ;;  %vm2120_vm10 = vcmask 64512  }
   0x2   :  { %3359 = sst [smem:[#allocation3_spill]] %s3331_s4  ;;  %s3365_s29 = sld [smem:[#allocation2_spill]]  ;;  %v122_v37 = vand.u32 127, %v121_v36 }
   0x3   :  { %3360 = sst [smem:[#allocation4_spill]] %s3332_s2  ;;  %s3366_s23 = sld [smem:[#allocation3_spill]] }
   0x4   :  { %3361 = sst [smem:[#allocation5_spill]] %s3333_s3  ;;  %s3367_s28 = sld [smem:[#allocation4_spill]]  ;;  %vm346_vm1 = vcmp.ge.s32.totalorder %v122_v37, 16  ;;  %vm347_vm2 = vcmp.lt.s32.totalorder %v122_v37, 32  ;;  %vm216_vm3 = vcmp.lt.s32.totalorder %v122_v37, 16 }
   0x5   :  { %3362 = sst [smem:[#allocation6_spill]] %s3334_s5  ;;  %s3368_s5 = sld [smem:[#allocation5_spill]]  ;;  %vm348_vm4 = vmand %vm346_vm1, %vm347_vm2  ;;  %v2964_v43 = vsel %vm216_vm3, 1.0, %v2802_v42 }
   0x6   :  { %3363 = sst [smem:[#allocation7_spill]] %s3335_s1  ;;  %s3369_s4 = sld [smem:[#allocation6_spill]]  ;;  %v2967_v44 = vsel %vm348_vm4, 1.0, %v2802_v42 }
   0x7   :  { %3364 = sst [smem:[#allocation8_spill]] %s3336_s6  ;;  %s2804_s6 = smov 64  }
   0x8   :  { %v71_v0 = vld [vmem:[%s3365_s29] sm:$0xff]  ;;  %v72_v1 = vld [vmem:[%s3365_s29 + $0x8] sm:$0xff]  ;;  %s3372_s2 = sld [smem:[#allocation7_spill]]  ;;  %s3373_s30 = sld [smem:[#allocation8_spill]] }
   0x9   :  { %v78_v2 = vsel %vm77_vm0, %v71_v0, 0.0  ;;  %v81_v3 = vsel %vm77_vm0, %v72_v1, 0.0  ;;  %v123_v14 = vld [vmem:[%s3366_s23] sm:$0xff]  ;;  %v124_v15 = vld [vmem:[%s3366_s23 + $0x8] sm:$0xff]  ;;  %v125_v16 = vld [vmem:[%s3366_s23 + $0x10] sm:$0xff] }
   0xa   :  { %79 = vadd.xlane.f32.xlu0 %v78_v2  ;;  %v2574_v17 = vpack.c.bf16 %v124_v15, %v123_v14  ;;  %v126_v18 = vld [vmem:[%s3366_s23 + $0x18] sm:$0xff]  ;;  %v2199_v27 = vld [vmem:[%s3367_s28] ss:$0 sm:$0xff] }
   0xb   :  { %v2578_v19 = vpack.c.bf16 %v126_v18, %v125_v16  ;;  %v2200_v29 = vld [vmem:[%s3368_s5] ss:$0 sm:$0xff] }
   0xc   :  { %2575 = vmatprep.subr.bf16.mxu0 %v2574_v17  ;;  %v2201_v38 = vld [vmem:[%s3369_s4] ss:$0 sm:$0xff] }
   0xd   :  { %2577 = vmatpush3.bf16.msra.mxu0 %v2574_v17 }
   0xe   :  { %82 = vadd.xlane.f32.xlu0 %v81_v3  ;;  %2579 = vmatprep.subr.bf16.mxu0 %v2578_v19  ;;  %v3005_v60 = vld [vmem:[%s3372_s2] sm:$0xff]  ;;  %v3010_v63 = vld [vmem:[%s3372_s2 + $0x8] sm:$0xff] }
  0x11   :  { %2581 = vmatpush3.bf16.msra.mxu0 %v2578_v19 }
  0x97   :  { %v80_v4 = vpop.xlane.xlu0 %79 }
  0x98   :  { %v85_v5 = vmul.f32 0.03125, %v80_v4 }
  0x9a   :  { %v87_v6 = vsub.f32 %v71_v0, %v85_v5 }
  0x9b   :  { %v83_v7 = vpop.xlane.xlu0 %82 }
  0x9c   :  { %v86_v8 = vmul.f32 0.03125, %v83_v7  ;;  %v89_v9 = vmul.f32 %v87_v6, %v87_v6 }
  0x9e   :  { %v88_v10 = vsub.f32 %v72_v1, %v86_v8  ;;  %v91_v11 = vsel %vm77_vm0, %v89_v9, 0.0 }
  0x9f   :  { %92 = vadd.xlane.f32.xlu1 %v91_v11 }
  0xa0   :  { %v90_v12 = vmul.f32 %v88_v10, %v88_v10 }
  0xa2   :  { %v94_v13 = vsel %vm77_vm0, %v90_v12, 0.0 }
  0xa3   :  { %95 = vadd.xlane.f32.xlu1 %v94_v13 }
 0x12c   :  { %v93_v20 = vpop.xlane.xlu1 %92 }
 0x12d   :  { %v97_v21 = vmul.f32 0.03125, %v93_v20 }
 0x12f   :  { %v99_v22 = vadd.f32 1e-12, %v97_v21 }
 0x130   :  { %v96_v23 = vpop.xlane.xlu1 %95 }
 0x131   :  { %2742 = vrsqrt.f32 %v99_v22  ;;  %v98_v24 = vmul.f32 0.03125, %v96_v23 }
 0x133   :  { %v100_v25 = vadd.f32 1e-12, %v98_v24 }
 0x135   :  { %2744 = vrsqrt.f32 %v100_v25 }
 0x13b   :  { %v2743_v26 = vpop.eup %2742 }
 0x13c   :  { %v103_v28 = vmul.f32 %v2743_v26, %v87_v6 }
 0x13e   :  { %v111_v30 = vmul.f32 %v2199_v27, %v103_v28 }
 0x13f   :  { %v2745_v31 = vpop.eup %2744 }
 0x140   :  { %v104_v32 = vmul.f32 %v2745_v31, %v88_v10  ;;  %v2950_v33 = vadd.f32 %v2200_v29, %v111_v30 }
 0x142   :  { %v112_v34 = vmul.f32 %v2199_v27, %v104_v32  ;;  %2399 = vmatprep.mubr.msk.f32.mxu0 %vm77_vm0, %v2950_v33 }
 0x144   :  { %v2954_v35 = vadd.f32 %v2200_v29, %v112_v34 }
 0x146   :  { %2400 = vmatmul.mubr.msk.f32.vlgmr.msra.gmra.mrb[0].mxu0 %vm77_vm0, %v2954_v35 }
 0x219   :  { %v2401_v39 = vpop.f32.mrb[0].mxu0 }
 0x21a   :  { %v2961_v40 = vadd.f32 %v2401_v39, %v2201_v38  ;;  %v206_v41 = vpop.f32.mrb[1].mxu0 }
 0x21b   :  { %v2969_v45 = vadd.f32 %v2201_v38, %v206_v41  ;;  %v644_v41 = vld [vmem:[%s3373_s30] sm:$0xff] }
 0x21c   :  { %v221_v54 = vmul.f32 %v2964_v43, %v2961_v40  ;;  %v352_v55 = vmul.f32 %v2967_v44, %v2961_v40 }
 0x21d   :  { %v2712_v46 = vpack.i.bf16 %v2961_v40, %v2969_v45  ;;  %v220_v47 = vmul.f32 %v2964_v43, %v2969_v45  ;;  %v351_v48 = vmul.f32 %v2967_v44, %v2969_v45 }
 0x21f   :  { %2713 = vrot.lane.b32.xlu0 %v2712_v46, %s2803_s24  ;;  %2406 = vmatprep.mubr.msk.f32.mxu1 %vm77_vm0, %v220_v47  ;;  %v645_v46 = vld [vmem:[%s3373_s30 + $0x8] sm:$0xff]  ;;  %v646_v47 = vld [vmem:[%s3373_s30 + $0x10] sm:$0xff] }
 0x220   :  { %2413 = vmatprep.mubr.msk.f32.mxu0 %vm77_vm0, %v351_v48  ;;  %v2602_v48 = vpack.c.bf16 %v645_v46, %v644_v41 }
 0x223   :  { %341 = vrot.lane.b32.xlu0 %v2964_v43, %s2804_s6 }
 0x291   :  { %v2714_v49 = vpop.permute.xlu0 %2713 }
 0x292   :  { %v2716_v50 = vunpack.i.h.bf16 %v2714_v49  ;;  %v2715_v51 = vunpack.i.l.bf16 %v2714_v49 }
 0x294   :  { %v2582_v53 = vpack.c.bf16 %v2716_v50, %v2715_v51 }
 0x295   :  { %v3024_v27 = vpop.permute.xlu0 %341 }
 0x296   :  { %2584 = vmatprep.subr.msk.bf16.mxu1 %vm2984_vm5, %v2582_v53  ;;  %2590 = vmatprep.subr.msk.bf16.mxu0 %vm2984_vm5, %v2582_v53  ;;  %v344_v28 = vmul.f32 %v3024_v27, %v2969_v45  ;;  %v345_v29 = vmul.f32 %v3024_v27, %v2961_v40 }
 0x297   :  { %2587 = vmatpush3.bf16.xpose.msk.msra.mxu1 %vm2984_vm5, %v2582_v53  ;;  %2593 = vmatpush3.bf16.xpose.msk.msra.mxu0 %vm2984_vm5, %v2582_v53 }
 0x298   :  { %v2722_v34 = vpack.i.bf16 %v345_v29, %v344_v28  ;;  %2603 = vmatprep.subr.bf16.mxu0 %v2602_v48  ;;  %v783_v29 = vld [vmem:[%s3338_s10 + $0x8] sm:$0xff] }
 0x29e   :  { %2407 = vmatmul.mubr.msk.f32.vlgmr.msra.gmra.mrb[0].mxu1 %vm77_vm0, %v221_v54  ;;  %2414 = vmatmul.mubr.msk.f32.vlgmr.msra.gmra.mrb[2].mxu0 %vm77_vm0, %v352_v55 }
 0x29f   :  { %2605 = vmatpush3.bf16.msra.mxu0 %v2602_v48 }
 0x371   :  { %v2408_v56 = vpop.f32.mrb[0].mxu1  ;;  %v2415_v57 = vpop.f32.mrb[2].mxu0 }
 0x372   :  { %v304_v58 = vpop.f32.mrb[1].mxu1  ;;  %v425_v59 = vpop.f32.mrb[3].mxu0  ;;  %v435_v61 = vmul.f32 0.25, %v2415_v57  ;;  %v314_v4 = vmul.f32 0.25, %v2408_v56 }
 0x373   :  { %v434_v62 = vmul.f32 0.25, %v425_v59  ;;  %v313_v1 = vmul.f32 0.25, %v304_v58 }
 0x374   :  { %v437_v3 = vadd.f32 %v435_v61, %v3010_v63  ;;  %v316_v8 = vadd.f32 %v314_v4, %v3010_v63 }
 0x375   :  { %v436_v0 = vadd.f32 %v434_v62, %v3005_v60  ;;  %v315_v6 = vadd.f32 %v313_v1, %v3005_v60 }
 0x376   :  { %v441_v5 = vsel %vm317_vm6, %v437_v3, -inf  ;;  %v321_v9 = vsel %vm317_vm6, %v316_v8, -inf }
 0x377   :  { %v438_v2 = vsel %vm317_vm6, %v436_v0, -inf  ;;  %v318_v7 = vsel %vm317_vm6, %v315_v6, -inf }
 0x378   :  { %439 = vmax.xlane.f32.xlu1 %v438_v2 }
 0x37c   :  { %442 = vmax.xlane.f32.xlu1 %v441_v5 }
 0x380   :  { %319 = vmax.xlane.f32.xlu1 %v318_v7 }
 0x384   :  { %322 = vmax.xlane.f32.xlu1 %v321_v9 }
 0x395   :  { %461 = vrot.lane.b32.xlu1 %v2967_v44, %s2804_s6 }
 0x405   :  { %v440_v10 = vpop.xlane.xlu1 %439 }
 0x406   :  { %v444_v15 = vsub.f32 %v436_v0, %v440_v10  ;;  %v2218_v10 = vld [vmem:[%s3337_s7] ss:$0 sm:$0xff] }
 0x408   :  { %v446_v18 = vmul.f32 1.442695, %v444_v15 }
 0x409   :  { %v443_v11 = vpop.xlane.xlu1 %442 }
 0x40a   :  { %v445_v12 = vsub.f32 %v437_v3, %v443_v11 }
 0x40c   :  { %v448_v13 = vmul.f32 1.442695, %v445_v12 }
 0x40d   :  { %v320_v14 = vpop.xlane.xlu1 %319 }
 0x40e   :  { %2746 = vpow2.f32 %v448_v13  ;;  %v324_v19 = vsub.f32 %v315_v6, %v320_v14 }
 0x410   :  { %v326_v22 = vmul.f32 1.442695, %v324_v19 }
 0x411   :  { %v323_v16 = vpop.xlane.xlu1 %322 }
 0x412   :  { %v325_v17 = vsub.f32 %v316_v8, %v323_v16 }
 0x414   :  { %v328_v20 = vmul.f32 1.442695, %v325_v17 }
 0x415   :  { %v3033_v36 = vpop.permute.xlu1 %461 }
 0x416   :  { %2748 = vpow2.f32 %v328_v20  ;;  %v464_v37 = vmul.f32 %v3033_v36, %v2969_v45  ;;  %v465_v38 = vmul.f32 %v3033_v36, %v2961_v40  ;;  %v647_v40 = vld [vmem:[%s3373_s30 + $0x18] sm:$0xff] }
 0x417   :  { %2750 = vpow2.f32 %v446_v18  ;;  %v2606_v45 = vpack.c.bf16 %v647_v40, %v646_v47  ;;  %v2221_v40 = vld [vmem:[%s3339_s8] ss:$0 sm:$0xff] }
 0x418   :  { %v2747_v21 = vpop.eup %2746  ;;  %2752 = vpow2.f32 %v326_v22  ;;  %v2717_v39 = vpack.i.bf16 %v465_v38, %v464_v37 }
 0x419   :  { %v453_v23 = vsel %vm317_vm6, %v2747_v21, 0.0  ;;  %2607 = vmatprep.subr.bf16.mxu0 %v2606_v45 }
 0x41a   :  { %454 = vadd.xlane.f32.xlu1 %v453_v23  ;;  %2609 = vmatpush3.bf16.msra.mxu0 %v2606_v45 }
 0x420   :  { %v2749_v24 = vpop.eup %2748 }
 0x421   :  { %v333_v25 = vsel %vm317_vm6, %v2749_v24, 0.0  ;;  %v2751_v26 = vpop.eup %2750 }
 0x422   :  { %334 = vadd.xlane.f32.xlu0 %v333_v25  ;;  %v450_v30 = vsel %vm317_vm6, %v2751_v26, 0.0  ;;  %v2753_v31 = vpop.eup %2752 }
 0x423   :  { %v330_v32 = vsel %vm317_vm6, %v2753_v31, 0.0 }
 0x426   :  { %451 = vadd.xlane.f32.xlu0 %v450_v30 }
 0x42a   :  { %331 = vadd.xlane.f32.xlu0 %v330_v32  ;;  %v785_v32 = vld [vmem:[%s3338_s10 + $0x18] sm:$0xff] }
 0x42b   :  { %2723 = vrot.lane.b32.xlu1 %v2722_v34, %s2804_s6 }
 0x440   :  { %2718 = vrot.lane.b32.xlu0 %v2717_v39, %s2804_s6 }
 0x4a7   :  { %v455_v50 = vpop.xlane.xlu1 %454 }
 0x4ab   :  { %v2724_v54 = vpop.permute.xlu1 %2723 }
 0x4ac   :  { %v2726_v56 = vunpack.i.h.bf16 %v2724_v54  ;;  %v2725_v57 = vunpack.i.l.bf16 %v2724_v54 }
 0x4ae   :  { %v2598_v2 = vpack.c.bf16 %v2726_v56, %v2725_v57  ;;  %v892_v57 = vld [vmem:[%s3341_s12] sm:$0xff] }
 0x4af   :  { %v335_v49 = vpop.xlane.xlu0 %334 }
 0x4b3   :  { %v452_v51 = vpop.xlane.xlu0 %451 }
 0x4b4   :  { %2754 = vrcp.f32 %v452_v51 }
 0x4b5   :  { %2756 = vrcp.f32 %v455_v50 }
 0x4b7   :  { %v332_v53 = vpop.xlane.xlu0 %331 }
 0x4b8   :  { %2758 = vrcp.f32 %v332_v53 }
 0x4b9   :  { %2760 = vrcp.f32 %v335_v49  ;;  %v2222_v49 = vld [vmem:[%s3340_s9] ss:$0 sm:$0xff] }
 0x4bb   :  { %v2719_v55 = vpop.permute.xlu0 %2718 }
 0x4bc   :  { %v2721_v58 = vunpack.i.h.bf16 %v2719_v55  ;;  %v2720_v59 = vunpack.i.l.bf16 %v2719_v55 }
 0x4be   :  { %v2755_v61 = vpop.eup %2754  ;;  %v2594_v62 = vpack.c.bf16 %v2721_v58, %v2720_v59  ;;  %v893_v58 = vld [vmem:[%s3341_s12 + $0x8] sm:$0xff] }
 0x4bf   :  { %v2757_v0 = vpop.eup %2756  ;;  %v458_v1 = vmul.f32 %v2755_v61, %v2751_v26  ;;  %v2618_v59 = vpack.c.bf16 %v893_v58, %v892_v57  ;;  %v894_v61 = vld [vmem:[%s3341_s12 + $0x10] sm:$0xff] }
 0x4c0   :  { %2595 = vmatprep.subr.bf16.mxu1 %v2594_v62  ;;  %v459_v4 = vmul.f32 %v2757_v0, %v2747_v21  ;;  %v2233_v58 = vld [vmem:[%s3366_s23 + $0x30] sm:$0xff] }
 0x4c1   :  { %2597 = vmatpush3.bf16.msra.mxu1 %v2594_v62  ;;  %2420 = vmatprep.mubr.msk.f32.mxu1 %vm317_vm6, %v458_v1  ;;  %v895_v62 = vld [vmem:[%s3341_s12 + $0x18] sm:$0xff]  ;;  %v896_v1 = vld [vmem:[%s3341_s12 + $0x20] sm:$0xff] }
 0x4c2   :  { %v2759_v3 = vpop.eup %2758  ;;  %2599 = vmatprep.subr.bf16.mxu1 %v2598_v2  ;;  %v2622_v0 = vpack.c.bf16 %v895_v62, %v894_v61  ;;  %2619 = vmatprep.subr.bf16.mxu0 %v2618_v59 }
 0x4c3   :  { %v338_v5 = vmul.f32 %v2759_v3, %v2753_v31  ;;  %v2761_v6 = vpop.eup %2760  ;;  %v784_v31 = vld [vmem:[%s3338_s10 + $0x10] sm:$0xff] }
 0x4c4   :  { %2421 = vmatmul.mubr.msk.f32.vlgmr.msra.gmra.mrb[2].mxu1 %vm317_vm6, %v459_v4  ;;  %v339_v7 = vmul.f32 %v2761_v6, %v2749_v24  ;;  %v2614_v34 = vpack.c.bf16 %v785_v32, %v784_v31  ;;  %v898_v4 = vld [vmem:[%s3341_s12 + $0x30] sm:$0xff] }
 0x4c5   :  { %2601 = vmatpush3.bf16.msra.mxu1 %v2598_v2  ;;  %2427 = vmatprep.mubr.msk.f32.mxu1 %vm317_vm6, %v338_v5  ;;  %v897_v2 = vld [vmem:[%s3341_s12 + $0x28] sm:$0xff]  ;;  %v899_v5 = vld [vmem:[%s3341_s12 + $0x38] sm:$0xff] }
 0x4c6   :  { %v2626_v3 = vpack.c.bf16 %v897_v2, %v896_v1  ;;  %v2630_v6 = vpack.c.bf16 %v899_v5, %v898_v4 }
 0x4cc   :  { %2428 = vmatmul.mubr.msk.f32.vlgmr.msra.gmra.mrb[2].mxu1 %vm317_vm6, %v339_v7  ;;  %v2223_v7 = vld [vmem:[%s3342_s11] ss:$0 sm:$0xff] }
 0x59f   :  { %v2429_v8 = vpop.f32.mrb[2].mxu1 }
 0x5a0   :  { %v635_v9 = vpop.f32.mrb[3].mxu1 }
 0x5a1   :  { %2438 = vmatprep.mubr.msk.f32.mxu0 %vm77_vm0, %v635_v9 }
 0x5a2   :  { %2439 = vmatmul.mubr.msk.f32.vlgmr.msra.gmra.mrb[4].mxu0 %vm77_vm0, %v2429_v8 }
 0x5a3   :  { %2621 = vmatpush3.bf16.msra.mxu0 %v2618_v59  ;;  %v2234_v59 = vld [vmem:[%s3366_s23 + $0x38] sm:$0xff] }
 0x5a4   :  { %2623 = vmatprep.subr.bf16.mxu0 %v2622_v0  ;;  %v2638_v61 = vpack.c.bf16 %v2234_v59, %v2233_v58 }
 0x5a7   :  { %2625 = vmatpush3.bf16.msra.mxu0 %v2622_v0 }
 0x5a8   :  { %2627 = vmatprep.subr.bf16.mxu0 %v2626_v3 }
 0x5ab   :  { %2629 = vmatpush3.bf16.msra.mxu0 %v2626_v3 }
 0x5ac   :  { %2631 = vmatprep.subr.bf16.mxu0 %v2630_v6 }
 0x5af   :  { %2633 = vmatpush3.bf16.msra.mxu0 %v2630_v6  ;;  %v2229_v6 = vld [vmem:[%s3344_s14] ss:$0 sm:$0xff] }
 0x675   :  { %v2440_v11 = vpop.f32.mrb[4].mxu0 }
 0x676   :  { %v733_v12 = vadd.f32 %v2440_v11, %v2218_v10  ;;  %v727_v13 = vpop.f32.mrb[5].mxu0 }
 0x677   :  { %v728_v14 = vadd.f32 %v2218_v10, %v727_v13 }
 0x678   :  { %v737_v15 = vadd.f32 %v733_v12, %v2954_v35 }
 0x679   :  { %v736_v16 = vadd.f32 %v728_v14, %v2950_v33  ;;  %v782_v33 = vld [vmem:[%s3338_s10] sm:$0xff] }
 0x67a   :  { %v743_v17 = vsel %vm77_vm0, %v737_v15, 0.0  ;;  %v2610_v30 = vpack.c.bf16 %v783_v29, %v782_v33  ;;  %v2226_v29 = vld [vmem:[%s3343_s13] ss:$0 sm:$0xff] }
 0x67b   :  { %744 = vadd.xlane.f32.xlu0 %v743_v17  ;;  %v740_v18 = vsel %vm77_vm0, %v736_v16, 0.0 }
 0x67c   :  { %741 = vadd.xlane.f32.xlu1 %v740_v18  ;;  %2611 = vmatprep.subr.bf16.mxu1 %v2610_v30 }
 0x67d   :  { %2613 = vmatpush3.bf16.msra.mxu1 %v2610_v30 }
 0x67e   :  { %2615 = vmatprep.subr.bf16.mxu1 %v2614_v34 }
 0x681   :  { %2617 = vmatpush3.bf16.msra.mxu1 %v2614_v34 }
 0x708   :  { %v745_v19 = vpop.xlane.xlu0 %744 }
 0x709   :  { %v747_v20 = vmul.f32 0.03125, %v745_v19  ;;  %v742_v21 = vpop.xlane.xlu1 %741 }
 0x70a   :  { %v746_v22 = vmul.f32 0.03125, %v742_v21 }
 0x70b   :  { %v749_v23 = vsub.f32 %v737_v15, %v747_v20 }
 0x70c   :  { %v748_v24 = vsub.f32 %v736_v16, %v746_v22 }
 0x70d   :  { %v751_v28 = vmul.f32 %v749_v23, %v749_v23 }
 0x70e   :  { %v750_v25 = vmul.f32 %v748_v24, %v748_v24 }
 0x70f   :  { %v755_v35 = vsel %vm77_vm0, %v751_v28, 0.0 }
 0x710   :  { %v752_v26 = vsel %vm77_vm0, %v750_v25, 0.0 }
 0x711   :  { %753 = vadd.xlane.f32.xlu0 %v752_v26 }
 0x715   :  { %756 = vadd.xlane.f32.xlu0 %v755_v35 }
 0x79e   :  { %v754_v37 = vpop.xlane.xlu0 %753 }
 0x79f   :  { %v758_v38 = vmul.f32 0.03125, %v754_v37 }
 0x7a1   :  { %v760_v39 = vadd.f32 1e-12, %v758_v38 }
 0x7a2   :  { %v757_v41 = vpop.xlane.xlu0 %756 }
 0x7a3   :  { %2762 = vrsqrt.f32 %v760_v39  ;;  %v759_v46 = vmul.f32 0.03125, %v757_v41 }
 0x7a5   :  { %v761_v47 = vadd.f32 1e-12, %v759_v46 }
 0x7a7   :  { %2764 = vrsqrt.f32 %v761_v47 }
 0x7ad   :  { %v2763_v48 = vpop.eup %2762 }
 0x7ae   :  { %v764_v45 = vmul.f32 %v2763_v48, %v748_v24 }
 0x7b0   :  { %v772_v50 = vmul.f32 %v2221_v40, %v764_v45 }
 0x7b1   :  { %v2765_v51 = vpop.eup %2764 }
 0x7b2   :  { %v765_v53 = vmul.f32 %v2765_v51, %v749_v23  ;;  %v780_v54 = vadd.f32 %v2222_v49, %v772_v50 }
 0x7b4   :  { %v773_v55 = vmul.f32 %v2221_v40, %v765_v53  ;;  %2449 = vmatprep.mubr.msk.f32.mxu1 %vm77_vm0, %v780_v54 }
 0x7b6   :  { %v781_v56 = vadd.f32 %v2222_v49, %v773_v55 }
 0x7b8   :  { %2450 = vmatmul.mubr.msk.f32.vlgmr.msra.gmra.mrb[4].mxu1 %vm77_vm0, %v781_v56 }
 0x88b   :  { %v2451_v8 = vpop.f32.mrb[4].mxu1 }
 0x88c   :  { %v871_v9 = vadd.f32 %v2451_v8, %v2223_v7  ;;  %v865_v10 = vpop.f32.mrb[5].mxu1 }
 0x88d   :  { %v866_v11 = vadd.f32 %v2223_v7, %v865_v10  ;;  %v2230_v10 = vld [vmem:[%s3345_s15] ss:$0 sm:$0xff] }
 0x88e   :  { %v877_v12 = vmul.f32 0.044715, %v871_v9  ;;  %v875_v28 = vmul.f32 0.5, %v871_v9 }
 0x88f   :  { %v876_v13 = vmul.f32 0.044715, %v866_v11  ;;  %v874_v25 = vmul.f32 0.5, %v866_v11 }
 0x890   :  { %v879_v14 = vmul.f32 %v877_v12, %v871_v9 }
 0x891   :  { %v878_v15 = vmul.f32 %v876_v13, %v866_v11 }
 0x892   :  { %v881_v16 = vmul.f32 %v879_v14, %v871_v9 }
 0x893   :  { %v880_v17 = vmul.f32 %v878_v15, %v866_v11  ;;  %v2236_v15 = vld [vmem:[%s3369_s4 + $0x1] ss:$0 sm:$0xff] }
 0x894   :  { %v883_v18 = vadd.f32 %v881_v16, %v871_v9 }
 0x895   :  { %v882_v19 = vadd.f32 %v880_v17, %v866_v11 }
 0x896   :  { %v885_v20 = vmul.f32 0.7978846, %v883_v18 }
 0x897   :  { %v884_v21 = vmul.f32 0.7978846, %v882_v19 }
 0x898   :  { %2766 = vtanh.f32 %v885_v20 }
 0x899   :  { %2768 = vtanh.f32 %v884_v21 }
 0x8a2   :  { %v2767_v22 = vpop.eup %2766 }
 0x8a3   :  { %v2769_v23 = vpop.eup %2768  ;;  %v889_v24 = vadd.f32 1.0, %v2767_v22 }
 0x8a4   :  { %v888_v26 = vadd.f32 1.0, %v2769_v23 }
 0x8a5   :  { %v891_v33 = vmul.f32 %v889_v24, %v875_v28 }
 0x8a6   :  { %v890_v35 = vmul.f32 %v888_v26, %v874_v25 }
 0x8a8   :  { %2468 = vmatprep.mubr.msk.f32.mxu0 %vm907_vm7, %v890_v35 }
 0x8a9   :  { %2469 = vmatmul.mubr.msk.f32.vlgmr.msra.gmra.mrb[6].mxu0 %vm907_vm7, %v891_v33 }
 0x97c   :  { %v2470_v30 = vpop.f32.mrb[6].mxu0 }
 0x97d   :  { %v986_v31 = vadd.f32 %v2470_v30, %v2226_v29  ;;  %v980_v32 = vpop.f32.mrb[7].mxu0 }
 0x97e   :  { %v981_v34 = vadd.f32 %v2226_v29, %v980_v32 }
 0x97f   :  { %v990_v37 = vadd.f32 %v986_v31, %v781_v56  ;;  %v2232_v56 = vld [vmem:[%s3366_s23 + $0x28] sm:$0xff] }
 0x980   :  { %v989_v38 = vadd.f32 %v981_v34, %v780_v54  ;;  %v2231_v54 = vld [vmem:[%s3366_s23 + $0x20] sm:$0xff] }
 0x981   :  { %v996_v39 = vsel %vm77_vm0, %v990_v37, 0.0  ;;  %v2634_v57 = vpack.c.bf16 %v2232_v56, %v2231_v54 }
 0x982   :  { %997 = vadd.xlane.f32.xlu0 %v996_v39  ;;  %v993_v41 = vsel %vm77_vm0, %v989_v38, 0.0 }
 0x983   :  { %994 = vadd.xlane.f32.xlu1 %v993_v41  ;;  %2635 = vmatprep.subr.bf16.mxu1 %v2634_v57 }
 0x984   :  { %2637 = vmatpush3.bf16.msra.mxu1 %v2634_v57 }
 0x985   :  { %2639 = vmatprep.subr.bf16.mxu1 %v2638_v61 }
 0x988   :  { %2641 = vmatpush3.bf16.msra.mxu1 %v2638_v61 }
 0xa0f   :  { %v998_v46 = vpop.xlane.xlu0 %997 }
 0xa10   :  { %v1000_v47 = vmul.f32 0.03125, %v998_v46  ;;  %v995_v48 = vpop.xlane.xlu1 %994 }
 0xa11   :  { %v999_v40 = vmul.f32 0.03125, %v995_v48 }
 0xa12   :  { %v1002_v45 = vsub.f32 %v990_v37, %v1000_v47 }
 0xa13   :  { %v1001_v49 = vsub.f32 %v989_v38, %v999_v40 }
 0xa14   :  { %v1004_v50 = vmul.f32 %v1002_v45, %v1002_v45 }
 0xa15   :  { %v1003_v51 = vmul.f32 %v1001_v49, %v1001_v49 }
 0xa16   :  { %v1008_v53 = vsel %vm77_vm0, %v1004_v50, 0.0 }
 0xa17   :  { %1009 = vadd.xlane.f32.xlu0 %v1008_v53  ;;  %v1005_v55 = vsel %vm77_vm0, %v1003_v51, 0.0 }
 0xa18   :  { %1006 = vadd.xlane.f32.xlu1 %v1005_v55 }
 0xaa4   :  { %v1010_v62 = vpop.xlane.xlu0 %1009 }
 0xaa5   :  { %v1012_v0 = vmul.f32 0.03125, %v1010_v62  ;;  %v1007_v1 = vpop.xlane.xlu1 %1006 }
 0xaa6   :  { %v1011_v2 = vmul.f32 0.03125, %v1007_v1 }
 0xaa7   :  { %v1014_v3 = vadd.f32 1e-12, %v1012_v0 }
 0xaa8   :  { %v1013_v4 = vadd.f32 1e-12, %v1011_v2 }
 0xaa9   :  { %2770 = vrsqrt.f32 %v1014_v3 }
 0xaaa   :  { %2772 = vrsqrt.f32 %v1013_v4 }
 0xab3   :  { %v2771_v5 = vpop.eup %2770 }
 0xab4   :  { %v2773_v7 = vpop.eup %2772  ;;  %v1018_v8 = vmul.f32 %v2771_v5, %v1002_v45 }
 0xab5   :  { %v1017_v9 = vmul.f32 %v2773_v7, %v1001_v49 }
 0xab6   :  { %v1026_v11 = vmul.f32 %v2229_v6, %v1018_v8  ;;  %v2251_v8 = vld [vmem:[%s3373_s30 + $0x20] sm:$0xff] }
 0xab7   :  { %v1025_v12 = vmul.f32 %v2229_v6, %v1017_v9  ;;  %v2252_v9 = vld [vmem:[%s3373_s30 + $0x28] sm:$0xff] }
 0xab8   :  { %v3143_v14 = vadd.f32 %v2230_v10, %v1026_v11  ;;  %v2662_v11 = vpack.c.bf16 %v2252_v9, %v2251_v8 }
 0xab9   :  { %v3141_v13 = vadd.f32 %v2230_v10, %v1025_v12  ;;  %v2253_v10 = vld [vmem:[%s3373_s30 + $0x30] sm:$0xff]  ;;  %v2254_v12 = vld [vmem:[%s3373_s30 + $0x38] sm:$0xff] }
 0xabb   :  { %2479 = vmatprep.mubr.msk.f32.mxu1 %vm77_vm0, %v3141_v13 }
 0xabc   :  { %2480 = vmatmul.mubr.msk.f32.vlgmr.msra.gmra.mrb[6].mxu1 %vm77_vm0, %v3143_v14 }
 0xb8f   :  { %v2481_v16 = vpop.f32.mrb[6].mxu1 }
 0xb90   :  { %v1126_v17 = vadd.f32 %v2481_v16, %v2236_v15  ;;  %v1120_v18 = vpop.f32.mrb[7].mxu1 }
 0xb91   :  { %v1121_v19 = vadd.f32 %v2236_v15, %v1120_v18  ;;  %v2666_v15 = vpack.c.bf16 %v2254_v12, %v2253_v10 }
 0xb92   :  { %v3153_v20 = vmul.f32 %v1126_v17, %v3024_v27  ;;  %v3156_v21 = vmul.f32 %v1126_v17, %v3033_v36  ;;  %v1251_v31 = vmul.f32 %v2967_v44, %v1126_v17 }
 0xb93   :  { %v2727_v22 = vpack.i.bf16 %v1126_v17, %v1121_v19  ;;  %v1129_v23 = vmul.f32 %v2964_v43, %v1121_v19  ;;  %v1250_v24 = vmul.f32 %v2967_v44, %v1121_v19  ;;  %v3161_v25 = vmul.f32 %v1121_v19, %v3024_v27 }
 0xb94   :  { %v3164_v26 = vmul.f32 %v1121_v19, %v3033_v36  ;;  %v1130_v36 = vmul.f32 %v2964_v43, %v1126_v17 }
 0xb95   :  { %2728 = vrot.lane.b32.xlu1 %v2727_v22, %s2803_s24  ;;  %2486 = vmatprep.mubr.msk.f32.mxu1 %vm77_vm0, %v1129_v23  ;;  %v2737_v28 = vpack.i.bf16 %v3153_v20, %v3161_v25 }
 0xb96   :  { %2493 = vmatprep.mubr.msk.f32.mxu0 %vm77_vm0, %v1250_v24  ;;  %v2732_v35 = vpack.i.bf16 %v3156_v21, %v3164_v26 }
 0xc07   :  { %v2729_v33 = vpop.permute.xlu1 %2728 }
 0xc08   :  { %v2731_v29 = vunpack.i.h.bf16 %v2729_v33  ;;  %v2730_v30 = vunpack.i.l.bf16 %v2729_v33 }
 0xc0a   :  { %v2642_v27 = vpack.c.bf16 %v2731_v29, %v2730_v30 }
 0xc0c   :  { %2644 = vmatprep.subr.msk.bf16.mxu1 %vm2984_vm5, %v2642_v27  ;;  %2650 = vmatprep.subr.msk.bf16.mxu0 %vm2984_vm5, %v2642_v27 }
 0xc0d   :  { %2647 = vmatpush3.bf16.xpose.msk.msra.mxu1 %vm2984_vm5, %v2642_v27  ;;  %2653 = vmatpush3.bf16.xpose.msk.msra.mxu0 %vm2984_vm5, %v2642_v27 }
 0xc0e   :  { %2663 = vmatprep.subr.bf16.mxu0 %v2662_v11 }
 0xc14   :  { %2487 = vmatmul.mubr.msk.f32.vlgmr.msra.gmra.mrb[8].mxu1 %vm77_vm0, %v1130_v36  ;;  %2494 = vmatmul.mubr.msk.f32.vlgmr.msra.gmra.mrb[8].mxu0 %vm77_vm0, %v1251_v31 }
 0xc15   :  { %2665 = vmatpush3.bf16.msra.mxu0 %v2662_v11 }
 0xc16   :  { %2667 = vmatprep.subr.bf16.mxu0 %v2666_v15 }
 0xc19   :  { %2669 = vmatpush3.bf16.msra.mxu0 %v2666_v15 }
 0xce7   :  { %v2488_v32 = vpop.f32.mrb[8].mxu1  ;;  %v2495_v34 = vpop.f32.mrb[8].mxu0 }
 0xce8   :  { %v1213_v37 = vpop.f32.mrb[9].mxu1  ;;  %v1324_v38 = vpop.f32.mrb[9].mxu0  ;;  %v1334_v39 = vmul.f32 0.25, %v2495_v34  ;;  %v1223_v43 = vmul.f32 0.25, %v2488_v32 }
 0xce9   :  { %v1333_v41 = vmul.f32 0.25, %v1324_v38  ;;  %v1222_v47 = vmul.f32 0.25, %v1213_v37  ;;  %v2256_v38 = vld [vmem:[%s3337_s7 + $0x1] ss:$0 sm:$0xff] }
 0xcea   :  { %v1336_v48 = vadd.f32 %v1334_v39, %v3010_v63  ;;  %v1225_v49 = vadd.f32 %v1223_v43, %v3010_v63 }
 0xceb   :  { %v1335_v46 = vadd.f32 %v1333_v41, %v3005_v60  ;;  %v1224_v40 = vadd.f32 %v1222_v47, %v3005_v60 }
 0xcec   :  { %v1340_v44 = vsel %vm317_vm6, %v1336_v48, -inf  ;;  %v1229_v50 = vsel %vm317_vm6, %v1225_v49, -inf }
 0xced   :  { %v1337_v52 = vsel %vm317_vm6, %v1335_v46, -inf  ;;  %v1226_v45 = vsel %vm317_vm6, %v1224_v40, -inf }
 0xcee   :  { %1338 = vmax.xlane.f32.xlu0 %v1337_v52 }
 0xcf2   :  { %1341 = vmax.xlane.f32.xlu0 %v1340_v44 }
 0xcf6   :  { %1227 = vmax.xlane.f32.xlu0 %v1226_v45 }
 0xcfa   :  { %1230 = vmax.xlane.f32.xlu0 %v1229_v50 }
 0xd7b   :  { %v1339_v51 = vpop.xlane.xlu0 %1338 }
 0xd7c   :  { %v1343_v53 = vsub.f32 %v1335_v46, %v1339_v51 }
 0xd7e   :  { %v1345_v55 = vmul.f32 1.442695, %v1343_v53 }
 0xd7f   :  { %v1342_v54 = vpop.xlane.xlu0 %1341 }
 0xd80   :  { %2774 = vpow2.f32 %v1345_v55  ;;  %v1344_v56 = vsub.f32 %v1336_v48, %v1342_v54 }
 0xd82   :  { %v1347_v57 = vmul.f32 1.442695, %v1344_v56 }
 0xd83   :  { %v1228_v58 = vpop.xlane.xlu0 %1227 }
 0xd84   :  { %2776 = vpow2.f32 %v1347_v57  ;;  %v1232_v59 = vsub.f32 %v1224_v40, %v1228_v58  ;;  %v2264_v57 = vld [vmem:[%s3338_s10 + $0x28] sm:$0xff] }
 0xd86   :  { %v1234_v0 = vmul.f32 1.442695, %v1232_v59  ;;  %v2265_v59 = vld [vmem:[%s3338_s10 + $0x30] sm:$0xff] }
 0xd87   :  { %v1231_v60 = vpop.xlane.xlu0 %1230 }
 0xd88   :  { %v1233_v61 = vsub.f32 %v1225_v49, %v1231_v60  ;;  %v2266_v60 = vld [vmem:[%s3338_s10 + $0x38] sm:$0xff] }
 0xd8a   :  { %v2775_v62 = vpop.eup %2774  ;;  %v1236_v1 = vmul.f32 1.442695, %v1233_v61  ;;  %v2674_v61 = vpack.c.bf16 %v2266_v60, %v2265_v59 }
 0xd8b   :  { %v1349_v63 = vsel %vm317_vm6, %v2775_v62, 0.0 }
 0xd8c   :  { %2778 = vpow2.f32 %v1236_v1  ;;  %1350 = vadd.xlane.f32.xlu1 %v1349_v63 }
 0xd8d   :  { %2780 = vpow2.f32 %v1234_v0 }
 0xd8e   :  { %v2777_v2 = vpop.eup %2776 }
 0xd8f   :  { %v1352_v3 = vsel %vm317_vm6, %v2777_v2, 0.0 }
 0xd90   :  { %1353 = vadd.xlane.f32.xlu0 %v1352_v3 }
 0xd96   :  { %v2779_v4 = vpop.eup %2778 }
 0xd97   :  { %v1241_v5 = vsel %vm317_vm6, %v2779_v4, 0.0  ;;  %v2781_v6 = vpop.eup %2780 }
 0xd98   :  { %1242 = vadd.xlane.f32.xlu0 %v1241_v5  ;;  %v1238_v7 = vsel %vm317_vm6, %v2781_v6, 0.0  ;;  %v2261_v5 = vld [vmem:[%s3339_s8 + $0x1] ss:$0 sm:$0xff] }
 0xd9c   :  { %1239 = vadd.xlane.f32.xlu0 %v1238_v7  ;;  %v2262_v7 = vld [vmem:[%s3340_s9 + $0x1] ss:$0 sm:$0xff] }
 0xd9d   :  { %2738 = vrot.lane.b32.xlu1 %v2737_v28, %s2804_s6 }
 0xdb2   :  { %2733 = vrot.lane.b32.xlu0 %v2732_v35, %s2804_s6 }
 0xe19   :  { %v1351_v16 = vpop.xlane.xlu1 %1350 }
 0xe1a   :  { %2782 = vrcp.f32 %v1351_v16  ;;  %v2271_v16 = vld [vmem:[%s3341_s12 + $0x40] sm:$0xff] }
 0xe1d   :  { %v1354_v17 = vpop.xlane.xlu0 %1353  ;;  %v2739_v22 = vpop.permute.xlu1 %2738 }
 0xe1e   :  { %2784 = vrcp.f32 %v1354_v17  ;;  %v2741_v24 = vunpack.i.h.bf16 %v2739_v22  ;;  %v2740_v25 = vunpack.i.l.bf16 %v2739_v22  ;;  %v2272_v17 = vld [vmem:[%s3341_s12 + $0x48] sm:$0xff]  ;;  %v2275_v22 = vld [vmem:[%s3341_s12 + $0x60] sm:$0xff] }
 0xe20   :  { %v2658_v29 = vpack.c.bf16 %v2741_v24, %v2740_v25  ;;  %v2277_v25 = vld [vmem:[%s3341_s12 + $0x70] sm:$0xff] }
 0xe24   :  { %v2783_v18 = vpop.eup %2782 }
 0xe25   :  { %v1243_v19 = vpop.xlane.xlu0 %1242  ;;  %v1357_v20 = vmul.f32 %v2783_v18, %v2775_v62  ;;  %v2678_v18 = vpack.c.bf16 %v2272_v17, %v2271_v16 }
 0xe27   :  { %2500 = vmatprep.mubr.msk.f32.mxu1 %vm317_vm6, %v1357_v20  ;;  %v2274_v20 = vld [vmem:[%s3341_s12 + $0x58] sm:$0xff]  ;;  %2679 = vmatprep.subr.bf16.mxu0 %v2678_v18 }
 0xe28   :  { %v2785_v33 = vpop.eup %2784 }
 0xe29   :  { %v1240_v21 = vpop.xlane.xlu0 %1239  ;;  %v1358_v27 = vmul.f32 %v2785_v33, %v2777_v2 }
 0xe2a   :  { %2786 = vrcp.f32 %v1240_v21 }
 0xe2b   :  { %2788 = vrcp.f32 %v1243_v19  ;;  %v2273_v19 = vld [vmem:[%s3341_s12 + $0x50] sm:$0xff] }
 0xe2c   :  { %v2682_v21 = vpack.c.bf16 %v2274_v20, %v2273_v19 }
 0xe2d   :  { %v2734_v23 = vpop.permute.xlu0 %2733 }
 0xe2e   :  { %v2736_v26 = vunpack.i.h.bf16 %v2734_v23  ;;  %v2735_v28 = vunpack.i.l.bf16 %v2734_v23  ;;  %v2276_v23 = vld [vmem:[%s3341_s12 + $0x68] sm:$0xff] }
 0xe2f   :  { %v2686_v24 = vpack.c.bf16 %v2276_v23, %v2275_v22  ;;  %v2286_v23 = vld [vmem:[%s3345_s15 + $0x1] ss:$0 sm:$0xff] }
 0xe30   :  { %v2654_v35 = vpack.c.bf16 %v2736_v26, %v2735_v28  ;;  %v2278_v26 = vld [vmem:[%s3341_s12 + $0x78] sm:$0xff] }
 0xe31   :  { %v2690_v28 = vpack.c.bf16 %v2278_v26, %v2277_v25 }
 0xe32   :  { %2655 = vmatprep.subr.bf16.mxu1 %v2654_v35 }
 0xe33   :  { %2657 = vmatpush3.bf16.msra.mxu1 %v2654_v35  ;;  %v2268_v35 = vld [vmem:[%s3342_s11 + $0x1] ss:$0 sm:$0xff] }
 0xe34   :  { %v2787_v30 = vpop.eup %2786  ;;  %2659 = vmatprep.subr.bf16.mxu1 %v2658_v29 }
 0xe35   :  { %v1246_v36 = vmul.f32 %v2787_v30, %v2781_v6  ;;  %v2789_v31 = vpop.eup %2788 }
 0xe36   :  { %2501 = vmatmul.mubr.msk.f32.vlgmr.msra.gmra.mrb[10].mxu1 %vm317_vm6, %v1358_v27  ;;  %v1247_v32 = vmul.f32 %v2789_v31, %v2779_v4 }
 0xe37   :  { %2661 = vmatpush3.bf16.msra.mxu1 %v2658_v29  ;;  %2507 = vmatprep.mubr.msk.f32.mxu1 %vm317_vm6, %v1246_v36 }
 0xe3e   :  { %2508 = vmatmul.mubr.msk.f32.vlgmr.msra.gmra.mrb[10].mxu1 %vm317_vm6, %v1247_v32 }
 0xf11   :  { %v2509_v34 = vpop.f32.mrb[10].mxu1 }
 0xf12   :  { %v1530_v37 = vpop.f32.mrb[11].mxu1 }
 0xf13   :  { %2518 = vmatprep.mubr.msk.f32.mxu0 %vm77_vm0, %v1530_v37 }
 0xf14   :  { %2519 = vmatmul.mubr.msk.f32.vlgmr.msra.gmra.mrb[10].mxu0 %vm77_vm0, %v2509_v34 }
 0xf15   :  { %2681 = vmatpush3.bf16.msra.mxu0 %v2678_v18 }
 0xf16   :  { %2683 = vmatprep.subr.bf16.mxu0 %v2682_v21 }
 0xf19   :  { %2685 = vmatpush3.bf16.msra.mxu0 %v2682_v21  ;;  %v2285_v21 = vld [vmem:[%s3344_s14 + $0x1] ss:$0 sm:$0xff] }
 0xf1a   :  { %2687 = vmatprep.subr.bf16.mxu0 %v2686_v24 }
 0xf1d   :  { %2689 = vmatpush3.bf16.msra.mxu0 %v2686_v24 }
 0xf1e   :  { %2691 = vmatprep.subr.bf16.mxu0 %v2690_v28 }
 0xf21   :  { %2693 = vmatpush3.bf16.msra.mxu0 %v2690_v28 }
 0xfe7   :  { %v2520_v39 = vpop.f32.mrb[10].mxu0 }
 0xfe8   :  { %v1630_v41 = vadd.f32 %v2520_v39, %v2256_v38  ;;  %v1624_v46 = vpop.f32.mrb[11].mxu0 }
 0xfe9   :  { %v1625_v47 = vadd.f32 %v2256_v38, %v1624_v46 }
 0xfea   :  { %v1634_v52 = vadd.f32 %v1630_v41, %v3143_v14 }
 0xfeb   :  { %v1633_v48 = vadd.f32 %v1625_v47, %v3141_v13  ;;  %v2263_v13 = vld [vmem:[%s3338_s10 + $0x20] sm:$0xff] }
 0xfec   :  { %v1642_v43 = vsel %vm77_vm0, %v1634_v52, 0.0  ;;  %v2670_v58 = vpack.c.bf16 %v2264_v57, %v2263_v13 }
 0xfed   :  { %1643 = vadd.xlane.f32.xlu1 %v1642_v43  ;;  %v1639_v44 = vsel %vm77_vm0, %v1633_v48, 0.0 }
 0xfee   :  { %1640 = vadd.xlane.f32.xlu0 %v1639_v44  ;;  %2671 = vmatprep.subr.bf16.mxu1 %v2670_v58 }
 0xfef   :  { %2673 = vmatpush3.bf16.msra.mxu1 %v2670_v58 }
 0xff0   :  { %2675 = vmatprep.subr.bf16.mxu1 %v2674_v61 }
 0xff3   :  { %2677 = vmatpush3.bf16.msra.mxu1 %v2674_v61 }
0x107a   :  { %v1644_v40 = vpop.xlane.xlu1 %1643 }
0x107b   :  { %v1646_v45 = vmul.f32 0.03125, %v1644_v40  ;;  %v1641_v49 = vpop.xlane.xlu0 %1640 }
0x107c   :  { %v1645_v50 = vmul.f32 0.03125, %v1641_v49 }
0x107d   :  { %v1648_v51 = vsub.f32 %v1634_v52, %v1646_v45 }
0x107e   :  { %v1647_v53 = vsub.f32 %v1633_v48, %v1645_v50 }
0x107f   :  { %v1650_v56 = vmul.f32 %v1648_v51, %v1648_v51 }
0x1080   :  { %v1649_v55 = vmul.f32 %v1647_v53, %v1647_v53 }
0x1081   :  { %v1654_v14 = vsel %vm77_vm0, %v1650_v56, 0.0 }
0x1082   :  { %v1651_v54 = vsel %vm77_vm0, %v1649_v55, 0.0 }
0x1083   :  { %1652 = vadd.xlane.f32.xlu0 %v1651_v54 }
0x1087   :  { %1655 = vadd.xlane.f32.xlu0 %v1654_v14 }
0x1110   :  { %v1653_v62 = vpop.xlane.xlu0 %1652 }
0x1111   :  { %v1657_v0 = vmul.f32 0.03125, %v1653_v62 }
0x1113   :  { %v1659_v1 = vadd.f32 1e-12, %v1657_v0 }
0x1114   :  { %v1656_v63 = vpop.xlane.xlu0 %1655 }
0x1115   :  { %2790 = vrsqrt.f32 %v1659_v1  ;;  %v1658_v2 = vmul.f32 0.03125, %v1656_v63 }
0x1117   :  { %v1660_v3 = vadd.f32 1e-12, %v1658_v2 }
0x1119   :  { %2792 = vrsqrt.f32 %v1660_v3 }
0x111f   :  { %v2791_v4 = vpop.eup %2790 }
0x1120   :  { %v1663_v6 = vmul.f32 %v2791_v4, %v1647_v53 }
0x1122   :  { %v1671_v8 = vmul.f32 %v2261_v5, %v1663_v6  ;;  %v1945_v6 = vld [vmem:[%s3346_s16 + $0x8] sm:$0xff] }
0x1123   :  { %v2793_v9 = vpop.eup %2792 }
0x1124   :  { %v1664_v10 = vmul.f32 %v2793_v9, %v1648_v51  ;;  %v1679_v11 = vadd.f32 %v2262_v7, %v1671_v8  ;;  %v2280_v51 = vld [vmem:[%s3343_s13 + $0x1] ss:$0 sm:$0xff]  ;;  %v2805_v8 = vmov 0.0|0.0   ;;  %v1946_v9 = vld [vmem:[%s3346_s16 + $0x10] sm:$0xff] }
0x1125   :  { %2694 = vmatprep.subr.bf16.mxu1 %v2805_v8 }
0x1126   :  { %v1672_v12 = vmul.f32 %v2261_v5, %v1664_v10  ;;  %2529 = vmatprep.mubr.msk.f32.mxu1 %vm77_vm0, %v1679_v11  ;;  %v1944_v5 = vld [vmem:[%s3346_s16] sm:$0xff]  ;;  %v1947_v10 = vld [vmem:[%s3346_s16 + $0x18] sm:$0xff] }
0x1128   :  { %v1680_v15 = vadd.f32 %v2262_v7, %v1672_v12  ;;  %v2695_v7 = vpack.c.bf16 %v1945_v6, %v1944_v5 }
0x112a   :  { %2530 = vmatmul.mubr.msk.f32.vlgmr.msra.gmra.mrb[12].mxu1 %vm77_vm0, %v1680_v15 }
0x112b   :  { %2696 = vmatpush3.bf16.msra.mxu1 %v2695_v7  ;;  %2559 = vmatprep.mubr.msk.f32.mxu1 %vm2806_vm8, %v2802_v42 }
0x112c   :  { %2697 = vmatprep.subr.bf16.mxu1 %v2805_v8 }
0x11fd   :  { %v2531_v33 = vpop.f32.mrb[12].mxu1 }
0x11fe   :  { %v1772_v29 = vadd.f32 %v2531_v33, %v2268_v35  ;;  %v1766_v30 = vpop.f32.mrb[13].mxu1 }
0x11ff   :  { %v1767_v27 = vadd.f32 %v2268_v35, %v1766_v30 }
0x1200   :  { %v1778_v36 = vmul.f32 0.044715, %v1772_v29  ;;  %v1776_v45 = vmul.f32 0.5, %v1772_v29 }
0x1201   :  { %v1777_v31 = vmul.f32 0.044715, %v1767_v27  ;;  %v1775_v44 = vmul.f32 0.5, %v1767_v27 }
0x1202   :  { %v1780_v32 = vmul.f32 %v1778_v36, %v1772_v29  ;;  %v2030_v36 = vld [vmem:[%s3347_s18 + $0x8] sm:$0xff] }
0x1203   :  { %v1779_v34 = vmul.f32 %v1777_v31, %v1767_v27 }
0x1204   :  { %v1782_v37 = vmul.f32 %v1780_v32, %v1772_v29  ;;  %v2287_v32 = vld [vmem:[%s3348_s17] ss:$0 sm:$0xff] }
0x1205   :  { %v1781_v38 = vmul.f32 %v1779_v34, %v1767_v27 }
0x1206   :  { %v1784_v39 = vadd.f32 %v1782_v37, %v1772_v29 }
0x1207   :  { %v1783_v41 = vadd.f32 %v1781_v38, %v1767_v27  ;;  %v2029_v27 = vld [vmem:[%s3347_s18] sm:$0xff] }
0x1208   :  { %v1786_v46 = vmul.f32 0.7978846, %v1784_v39  ;;  %v2701_v31 = vpack.c.bf16 %v2030_v36, %v2029_v27 }
0x1209   :  { %v1785_v47 = vmul.f32 0.7978846, %v1783_v41  ;;  %v2112_v41 = vld [vmem:[%s3349_s20] sm:$0xff] }
0x120a   :  { %2794 = vtanh.f32 %v1786_v46  ;;  %v2289_v46 = vld [vmem:[%s3350_s19] ss:$0 sm:$0xff] }
0x120b   :  { %2796 = vtanh.f32 %v1785_v47 }
0x1214   :  { %v2795_v52 = vpop.eup %2794 }
0x1215   :  { %v2797_v48 = vpop.eup %2796  ;;  %v1790_v43 = vadd.f32 1.0, %v2795_v52 }
0x1216   :  { %v1789_v40 = vadd.f32 1.0, %v2797_v48 }
0x1217   :  { %v1792_v50 = vmul.f32 %v1790_v43, %v1776_v45 }
0x1218   :  { %v1791_v49 = vmul.f32 %v1789_v40, %v1775_v44  ;;  %v2291_v44 = vld [vmem:[%s3351_s21] ss:$0 sm:$0xff] }
0x121a   :  { %2548 = vmatprep.mubr.msk.f32.mxu0 %vm907_vm7, %v1791_v49 }
0x121b   :  { %2549 = vmatmul.mubr.msk.f32.vlgmr.msra.gmra.mrb[12].mxu0 %vm907_vm7, %v1792_v50 }
0x12ee   :  { %v2550_v53 = vpop.f32.mrb[12].mxu0 }
0x12ef   :  { %v1888_v55 = vadd.f32 %v2550_v53, %v2280_v51  ;;  %v1882_v54 = vpop.f32.mrb[13].mxu0 }
0x12f0   :  { %v1883_v56 = vadd.f32 %v2280_v51, %v1882_v54 }
0x12f1   :  { %v1892_v14 = vadd.f32 %v1888_v55, %v1680_v15 }
0x12f2   :  { %v1891_v57 = vadd.f32 %v1883_v56, %v1679_v11  ;;  %v2698_v11 = vpack.c.bf16 %v1947_v10, %v1946_v9 }
0x12f3   :  { %v1900_v13 = vsel %vm77_vm0, %v1892_v14, 0.0 }
0x12f4   :  { %1901 = vadd.xlane.f32.xlu0 %v1900_v13  ;;  %v1897_v58 = vsel %vm77_vm0, %v1891_v57, 0.0  ;;  %2699 = vmatpush3.bf16.msra.mxu1 %v2698_v11 }
0x12f5   :  { %2700 = vmatprep.subr.bf16.mxu1 %v2805_v8 }
0x12f8   :  { %1898 = vadd.xlane.f32.xlu0 %v1897_v58 }
0x1381   :  { %v1902_v59 = vpop.xlane.xlu0 %1901 }
0x1382   :  { %v1904_v60 = vmul.f32 0.03125, %v1902_v59 }
0x1384   :  { %v1906_v61 = vsub.f32 %v1892_v14, %v1904_v60 }
0x1385   :  { %v1899_v62 = vpop.xlane.xlu0 %1898 }
0x1386   :  { %v1903_v0 = vmul.f32 0.03125, %v1899_v62  ;;  %v1908_v1 = vmul.f32 %v1906_v61, %v1906_v61 }
0x1388   :  { %v1905_v63 = vsub.f32 %v1891_v57, %v1903_v0  ;;  %v1912_v2 = vsel %vm77_vm0, %v1908_v1, 0.0 }
0x1389   :  { %1913 = vadd.xlane.f32.xlu0 %v1912_v2 }
0x138a   :  { %v1907_v3 = vmul.f32 %v1905_v63, %v1905_v63 }
0x138c   :  { %v1909_v4 = vsel %vm77_vm0, %v1907_v3, 0.0 }
0x138d   :  { %1910 = vadd.xlane.f32.xlu0 %v1909_v4 }
0x1416   :  { %v1914_v12 = vpop.xlane.xlu0 %1913 }
0x1417   :  { %v1916_v15 = vmul.f32 0.03125, %v1914_v12 }
0x1419   :  { %v1918_v16 = vadd.f32 1e-12, %v1916_v15 }
0x141a   :  { %v1911_v17 = vpop.xlane.xlu0 %1910 }
0x141b   :  { %2798 = vrsqrt.f32 %v1918_v16  ;;  %v1915_v18 = vmul.f32 0.03125, %v1911_v17 }
0x141d   :  { %v1917_v19 = vadd.f32 1e-12, %v1915_v18 }
0x141f   :  { %2800 = vrsqrt.f32 %v1917_v19 }
0x1425   :  { %v2799_v20 = vpop.eup %2798 }
0x1426   :  { %v1922_v22 = vmul.f32 %v2799_v20, %v1906_v61 }
0x1428   :  { %v1930_v24 = vmul.f32 %v2285_v21, %v1922_v22 }
0x1429   :  { %v2801_v25 = vpop.eup %2800 }
0x142a   :  { %v1921_v26 = vmul.f32 %v2801_v25, %v1905_v63  ;;  %v1938_v28 = vadd.f32 %v2286_v23, %v1930_v24 }
0x142c   :  { %v1929_v35 = vmul.f32 %v2285_v21, %v1921_v26  ;;  %v1940_v29 = vrot.slane %v1938_v28, 7 }
0x142e   :  { %v1937_v33 = vadd.f32 %v2286_v23, %v1929_v35 }
0x1430   :  { %v1943_v30 = vsel %vm1942_vm9, %v1937_v33, %v1940_v29 }
0x1431   :  { %2560 = vmatmul.mubr.msk.f32.vlgmr.msra.gmra.mrb[14].mxu1 %vm77_vm0, %v1943_v30 }
0x1432   :  { %2566 = vmatprep.mubr.msk.f32.mxu1 %vm2806_vm8, %v2802_v42  ;;  %2702 = vmatpush3.bf16.msra.mxu1 %v2701_v31 }
0x1433   :  { %2569 = vmatprep.subr.mxu1 %v2802_v42 }
0x1504   :  { %v2024_v34 = vpop.f32.mrb[14].mxu1 }
0x1505   :  { %v2025_v37 = vadd.f32 %v2287_v32, %v2024_v34  ;;  %v2561_v38 = vpop.f32.mrb[15].mxu1 }
0x1507   :  { %v2028_v39 = vmax.f32 %v2025_v37, 0.0 }
0x1509   :  { %2567 = vmatmul.mubr.msk.f32.vlgmr.msra.gmra.mrb[16].mxu1 %vm317_vm6, %v2028_v39 }
0x150a   :  { %2571 = vmatprep.mubr.msk.f32.mxu1 %vm2806_vm8, %v2802_v42  ;;  %2570 = vmatpush3.msra.mxu1 %v2112_v41 }
0x15dc   :  { %v2107_v47 = vpop.f32.mrb[16].mxu1 }
0x15dd   :  { %v2108_v52 = vadd.f32 %v2289_v46, %v2107_v47  ;;  %v2568_v48 = vpop.f32.mrb[17].mxu1 }
0x15df   :  { %v2111_v43 = vmax.f32 %v2108_v52, 0.0 }
0x15e1   :  { %2572 = vmatmul.mubr.msk.f32.vlgmr.msra.gmra.mrb[18].mxu1 %vm2120_vm10, %v2111_v43 }
0x16b4   :  { %v2190_v42 = vpop.f32.mrb[18].mxu1 }
0x16b5   :  { %v2191_v40 = vadd.f32 %v2291_v44, %v2190_v42  ;;  %v2573_v45 = vpop.f32.mrb[19].mxu1 }
0x16b7   :  { %2194 = vst [vmem:[%s3352_s22] sm:$0x3] %v2191_v40 }

</bundles_post_ra>
